<compile_context>
chip_gen: v7x
topology: tpu7x:2x2x1
jax: 0.10.0
libtpu: 0.0.40
codegen_flags: <defaults>
</compile_context>

<pallas_src>
from functools import partial

import numpy as np
import jax
import jax.numpy as jnp
from jax import lax
from jax.experimental import pallas as pl
from jax.experimental.pallas import tpu as pltpu


def _round_up(x, m):
    return ((x + m - 1) // m) * m


# ----------------------------------------------------------------------------- kernel


def _make_fused_kernel(num_layers, Bp, Hp, G, H, packed, chunk_sizes, unroll):
    """Single-invocation kernel: all LSTM layers + FC epilogue, state in VMEM."""

    def kernel(*args):
        x_ref = args[0]
        lw = args[1:1 + 3 * num_layers]            # (wih_p, whh_p, bias_p) per layer
        fcw_ref = args[1 + 3 * num_layers]
        fcb_ref = args[2 + 3 * num_layers]
        out_ref = args[3 + 3 * num_layers]
        gx_ref, seq_ref, h_ref, c_ref = args[4 + 3 * num_layers:]

        def run_layer(in_ref, wih_ref, whh_ref, b_ref, write_seq):
            h_ref[...] = jnp.zeros_like(h_ref)
            c_ref[...] = jnp.zeros_like(c_ref)

            t0 = 0
            for cs in chunk_sizes:                 # static time-chunk schedule
                # Phase A: hoisted input projection for this chunk -> one GEMM
                # (bf16 x bf16 -> f32 accumulate), bias folded, stored in gx scratch.
                x_blk = in_ref[t0 * Bp:(t0 + cs) * Bp, :]
                gx_ref[0:cs * Bp, :] = (
                    jnp.dot(x_blk, wih_ref[...],
                            preferred_element_type=jnp.float32)
                    + b_ref[...]).astype(gx_ref.dtype)

                # Phase B: sequential recurrence; only the unavoidable h @ W_hh
                # per step (cuDNN-style split).  Gate elementwise math in f32.
                def step(t, carry):
                    r = pl.multiple_of(t * Bp, Bp)          # sublane-aligned slab
                    gates = gx_ref[pl.ds(r, Bp), :].astype(jnp.float32) + jnp.dot(
                        h_ref[...].astype(whh_ref.dtype), whh_ref[...],
                        preferred_element_type=jnp.float32)
                    if packed:
                        # One 128-lane block [i|f|g|o]: 2 transcendental passes over
                        # the packed gates + 3 XLU lane rotations to align f/g/o
                        # with the h/c lanes [0, H).
                        sig = jax.nn.sigmoid(gates)
                        th = jnp.tanh(gates)
                        i_g = sig                                     # lanes [0, H)
                        f_g = pltpu.roll(sig, shift=(128 - H) % 128, axis=1)
                        g_g = pltpu.roll(th, shift=(128 - 2 * H) % 128, axis=1)
                        o_g = pltpu.roll(sig, shift=(128 - 3 * H) % 128, axis=1)
                    else:
                        # PyTorch gate order (i, f, g, o); each gate its own
                        # 128-aligned Hp block -> free lane-aligned slices.
                        i_g = jax.nn.sigmoid(gates[:, 0 * Hp:1 * Hp])
                        f_g = jax.nn.sigmoid(gates[:, 1 * Hp:2 * Hp])
                        g_g = jnp.tanh(gates[:, 2 * Hp:3 * Hp])
                        o_g = jax.nn.sigmoid(gates[:, 3 * Hp:4 * Hp])
                    c_new = f_g * c_ref[...] + i_g * g_g
                    h_new = o_g * jnp.tanh(c_new)
                    c_ref[...] = c_new
                    h_ref[...] = h_new
                    if write_seq:
                        rg = pl.multiple_of(t0 * Bp + t * Bp, Bp)
                        seq_ref[pl.ds(rg, Bp), :] = h_new.astype(seq_ref.dtype)
                    return carry

                lax.fori_loop(0, cs, step, 0, unroll=max(1, min(unroll, cs)))
                t0 += cs

        # Layer 0 reads x; subsequent layers read the previous layer's hidden
        # sequence from VMEM scratch (each chunk's gates are read from seq before
        # the same chunk's rows are overwritten by the current layer).
        run_layer(x_ref, lw[0], lw[1], lw[2], write_seq=num_layers > 1)
        for layer in range(1, num_layers):
            run_layer(seq_ref, lw[3 * layer], lw[3 * layer + 1], lw[3 * layer + 2],
                      write_seq=layer < num_layers - 1)

        # FC epilogue on the final hidden state (== out[:, -1, :] of the last layer).
        out_ref[...] = (
            jnp.dot(h_ref[...].astype(fcw_ref.dtype), fcw_ref[...],
                    preferred_element_type=jnp.float32)
            + fcb_ref[...])

    return kernel


# --------------------------------------------------------------------------- wrappers


def prepare_params(params, compute_dtype=jnp.bfloat16):
    """One-time repack (NOT per forward): transpose weights, fold b_ih+b_hh, pad
    gate columns to a lane-aligned layout, and cast matmul operands to
    `compute_dtype` (bf16 by default -> MXU-native on v5e/v6e/v7x).  Biases stay
    f32 (they are added to the f32 accumulator)."""
    H = params["lstm"][0][1].shape[1]
    Hp = _round_up(H, 128)
    packed = 4 * H <= 128
    G = 128 if packed else 4 * Hp
    layers = []
    for idx, (w_ih, w_hh, b_ih, b_hh) in enumerate(params["lstm"]):
        K = w_ih.shape[1]                       # input_size for layer 0, else H
        Kp = K if idx == 0 else Hp              # hidden-fed layers use padded rows
        wih_t = w_ih.T.astype(jnp.float32)      # (K, 4H)
        whh_t = w_hh.T.astype(jnp.float32)      # (H, 4H)
        bias = (b_ih + b_hh).astype(jnp.float32)
        wih_p = jnp.zeros((Kp, G), jnp.float32)
        whh_p = jnp.zeros((Hp, G), jnp.float32)
        b_p = jnp.zeros((1, G), jnp.float32)
        if packed:
            wih_p = wih_p.at[:K, :4 * H].set(wih_t)
            whh_p = whh_p.at[:H, :4 * H].set(whh_t)
            b_p = b_p.at[0, :4 * H].set(bias)
        else:
            for g in range(4):
                wih_p = wih_p.at[:K, g * Hp:g * Hp + H].set(wih_t[:, g * H:(g + 1) * H])
                whh_p = whh_p.at[:H, g * Hp:g * Hp + H].set(whh_t[:, g * H:(g + 1) * H])
                b_p = b_p.at[0, g * Hp:g * Hp + H].set(bias[g * H:(g + 1) * H])
        layers.append((wih_p.astype(compute_dtype), whh_p.astype(compute_dtype), b_p))
    fc_w = jnp.zeros((Hp, 128), jnp.float32).at[:H, 0].set(
        params["fc_w"][0].astype(jnp.float32)).astype(compute_dtype)
    fc_b = jnp.zeros((1, 128), jnp.float32).at[0, 0].set(
        params["fc_b"][0].astype(jnp.float32))
    return {"layers": tuple(layers), "fc_w": fc_w, "fc_b": fc_b, "hidden_size": H}


@partial(jax.jit, static_argnames=("hidden_size", "time_chunk", "unroll"))
def lstm_model_forward(x_btd, layer_weights, fc_w, fc_b, *, hidden_size,
                       time_chunk=32, unroll=8):
    """x_btd: [B, T, input_size] (batch_first). Returns [B, 1]."""
    B, T, Din = x_btd.shape
    num_layers = len(layer_weights)
    H = hidden_size
    Hp = fc_w.shape[0]
    packed = 4 * H <= 128
    G = 128 if packed else 4 * Hp
    Bp = _round_up(B, 8)
    compute_dtype = layer_weights[0][0].dtype

    # Time-major, batch padded to a sublane multiple, flattened so each timestep is
    # one aligned Bp-row slab: (T*Bp, Din).
    x_tbd = jnp.transpose(x_btd, (1, 0, 2))
    x_pad = jnp.pad(x_tbd, ((0, 0), (0, Bp - B), (0, 0)))
    x2d = x_pad.reshape(T * Bp, Din).astype(compute_dtype)

    # Static time-chunk schedule: the gates scratch only holds Tc timesteps.
    Tc = max(1, min(time_chunk, T))
    chunk_sizes = [Tc] * (T // Tc) + ([T % Tc] if T % Tc else [])

    flat_w = []
    for (wih_p, whh_p, b_p) in layer_weights:
        flat_w += [wih_p, whh_p, b_p]

    # Explicit VMEM budget: scratch + resident operands + headroom (review item 1).
    itm = np.dtype(compute_dtype).itemsize
    scratch_bytes = (Tc * Bp * G * itm          # gates for the current chunk
                     + T * Bp * Hp * itm        # inter-layer hidden sequence
                     + 2 * Bp * Hp * 4)         # h / c state (f32)
    operand_bytes = (T * Bp * Din * itm
                     + sum(int(np.prod(w.shape)) * np.dtype(w.dtype).itemsize
                           for w in flat_w + [fc_w, fc_b])
                     + Bp * 128 * 4)            # output
    vmem_limit = int(min(96 * 1024 * 1024,
                         max(16 * 1024 * 1024,
                             (scratch_bytes + operand_bytes) * 5 // 4 + (2 << 20))))

    out = pl.pallas_call(
        _make_fused_kernel(num_layers, Bp, Hp, G, H, packed, chunk_sizes, unroll),
        out_shape=jax.ShapeDtypeStruct((Bp, 128), jnp.float32),
        scratch_shapes=[
            pltpu.VMEM((Tc * Bp, G), compute_dtype),  # gates_x for current chunk
            pltpu.VMEM((T * Bp, Hp), compute_dtype),  # inter-layer hidden sequence
            pltpu.VMEM((Bp, Hp), jnp.float32),        # h state
            pltpu.VMEM((Bp, Hp), jnp.float32),        # c state
        ],
        compiler_params=pltpu.CompilerParams(vmem_limit_bytes=vmem_limit),
    )(x2d, *flat_w, fc_w, fc_b)
    return out[:B, 0:1]


# ------------------------------------------------------------------------ params/ref


def init_params(key, input_size, hidden_size, num_layers):
    """Deterministic init matching PyTorch shapes (uniform(-1/sqrt(H), 1/sqrt(H)))."""
    k = 1.0 / float(hidden_size) ** 0.5
    keys = jax.random.split(key, num_layers * 4 + 2)
    params = {"lstm": []}
    idx = 0
    d_in = input_size
    for _ in range(num_layers):
        w_ih = jax.random.uniform(keys[idx], (4 * hidden_size, d_in),
                                  minval=-k, maxval=k, dtype=jnp.float32); idx += 1
        w_hh = jax.random.uniform(keys[idx], (4 * hidden_size, hidden_size),
                                  minval=-k, maxval=k, dtype=jnp.float32); idx += 1
        b_ih = jax.random.uniform(keys[idx], (4 * hidden_size,),
                                  minval=-k, maxval=k, dtype=jnp.float32); idx += 1
        b_hh = jax.random.uniform(keys[idx], (4 * hidden_size,),
                                  minval=-k, maxval=k, dtype=jnp.float32); idx += 1
        params["lstm"].append((w_ih, w_hh, b_ih, b_hh))
        d_in = hidden_size
    params["fc_w"] = jax.random.uniform(keys[idx], (1, hidden_size),
                                        minval=-k, maxval=k, dtype=jnp.float32); idx += 1
    params["fc_b"] = jax.random.uniform(keys[idx], (1,),
                                        minval=-k, maxval=k, dtype=jnp.float32)
    return params


def reference_forward(x_btd, params):
    """Pure-JAX reference mirroring torch.nn.LSTM + Linear semantics."""
    x = x_btd
    B = x.shape[0]
    for (w_ih, w_hh, b_ih, b_hh) in params["lstm"]:
        H = w_hh.shape[1]
        h = jnp.zeros((B, H), jnp.float32)
        c = jnp.zeros((B, H), jnp.float32)
        outs = []
        for t in range(x.shape[1]):
            gates = x[:, t, :] @ w_ih.T + h @ w_hh.T + b_ih + b_hh
            i = jax.nn.sigmoid(gates[:, 0 * H:1 * H])
            f = jax.nn.sigmoid(gates[:, 1 * H:2 * H])
            g = jnp.tanh(gates[:, 2 * H:3 * H])
            o = jax.nn.sigmoid(gates[:, 3 * H:4 * H])
            c = f * c + i * g
            h = o * jnp.tanh(c)
            outs.append(h)
        x = jnp.stack(outs, axis=1)
    return x[:, -1, :] @ params["fc_w"].T + params["fc_b"]


# TODO(synk): train_validate_one_epoch (DataLoader / optimizer / backward) is a
# host-side training loop, not part of the forward pass — not translated to Pallas.

if __name__ == "__main__":
    B, T, INPUT_SIZE, HIDDEN, LAYERS = 2, 8, 4, 32, 2

    key = jax.random.PRNGKey(0)
    k_x, k_p = jax.random.split(key)
    x = jax.random.normal(k_x, (B, T, INPUT_SIZE), dtype=jnp.float32)
    params = init_params(k_p, INPUT_SIZE, HIDDEN, LAYERS)
    ref = reference_forward(x, params)

    # f32 variant: tight check against the pure-JAX reference (correctness anchor).
    p32 = prepare_params(params, compute_dtype=jnp.float32)
    out32 = lstm_model_forward(x, p32["layers"], p32["fc_w"], p32["fc_b"],
                               hidden_size=p32["hidden_size"])
    out32 = jax.block_until_ready(out32)
    assert out32.shape == (B, 1), out32.shape
    assert jnp.allclose(out32, ref, atol=1e-5, rtol=1e-5), (out32, ref)

    # bf16 variant (default perf path): MXU-native matmuls, f32 accumulation;
    # tolerance relaxed accordingly vs. the f32 reference.
    p16 = prepare_params(params)  # compute_dtype=bfloat16
    out16 = lstm_model_forward(x, p16["layers"], p16["fc_w"], p16["fc_b"],
                               hidden_size=p16["hidden_size"])
    out16 = jax.block_until_ready(out16)
    assert out16.shape == (B, 1), out16.shape
    assert jnp.allclose(out16, ref, atol=5e-2, rtol=5e-2), (out16, ref)

    print("KERNEL_OK")
</pallas_src>

<mosaic_0001>
module attributes {stable_mosaic.version = 11 : i64} {
  func.func @kernel(%arg0: memref<64x4xf32, #tpu.memory_space<vmem>>, %arg1: memref<4x128xf32, #tpu.memory_space<vmem>>, %arg2: memref<128x128xf32, #tpu.memory_space<vmem>>, %arg3: memref<1x128xf32, #tpu.memory_space<vmem>>, %arg4: memref<128x128xf32, #tpu.memory_space<vmem>>, %arg5: memref<128x128xf32, #tpu.memory_space<vmem>>, %arg6: memref<1x128xf32, #tpu.memory_space<vmem>>, %arg7: memref<128x128xf32, #tpu.memory_space<vmem>>, %arg8: memref<1x128xf32, #tpu.memory_space<vmem>>, %arg9: memref<8x128xf32, #tpu.memory_space<vmem>>, %arg10: memref<64x128xf32, #tpu.memory_space<vmem>>, %arg11: memref<64x128xf32, #tpu.memory_space<vmem>>, %arg12: memref<8x128xf32, #tpu.memory_space<vmem>>, %arg13: memref<8x128xf32, #tpu.memory_space<vmem>>) attributes {dimension_semantics = [], scalar_prefetch = 0 : i64, scratch_operands = 4 : i64, tpu.core_type = #tpu.core_type<tc>} {
    %cst = arith.constant 0.000000e+00 : f32
    %0 = vector.broadcast %cst : f32 to vector<8x128xf32>
    %c0 = arith.constant 0 : index
    %c0_0 = arith.constant 0 : index
    %1 = vector.load %arg12[%c0, %c0_0] : memref<8x128xf32, #tpu.memory_space<vmem>>, vector<8x128xf32>
    tpu.vector_store %arg12[%c0, %c0_0], %0 {strides = array<i32>} : memref<8x128xf32, #tpu.memory_space<vmem>>, vector<8x128xf32>,
    %cst_1 = arith.constant 0.000000e+00 : f32
    %2 = vector.broadcast %cst_1 : f32 to vector<8x128xf32>
    %c0_2 = arith.constant 0 : index
    %c0_3 = arith.constant 0 : index
    %3 = vector.load %arg13[%c0_2, %c0_3] : memref<8x128xf32, #tpu.memory_space<vmem>>, vector<8x128xf32>
    tpu.vector_store %arg13[%c0_2, %c0_3], %2 {strides = array<i32>} : memref<8x128xf32, #tpu.memory_space<vmem>>, vector<8x128xf32>,
    %c0_4 = arith.constant 0 : index
    %c0_5 = arith.constant 0 : index
    %4 = vector.load %arg0[%c0_4, %c0_5] : memref<64x4xf32, #tpu.memory_space<vmem>>, vector<64x4xf32>
    %c0_6 = arith.constant 0 : index
    %c0_7 = arith.constant 0 : index
    %5 = vector.load %arg1[%c0_6, %c0_7] : memref<4x128xf32, #tpu.memory_space<vmem>>, vector<4x128xf32>
    %cst_8 = arith.constant dense<0.000000e+00> : vector<64x128xf32>
    %6 = tpu.matmul %4, %5, %cst_8 {dimension_numbers = #tpu.dot_dimension_numbers<[1], [0], [0], [1], [0, 0, 1, 1], [], []>} : vector<64x4xf32>, vector<4x128xf32>, vector<64x128xf32> -> vector<64x128xf32>
    %c0_9 = arith.constant 0 : index
    %c0_10 = arith.constant 0 : index
    %7 = vector.load %arg3[%c0_9, %c0_10] : memref<1x128xf32, #tpu.memory_space<vmem>>, vector<1x128xf32>
    %8 = vector.broadcast %7 : vector<1x128xf32> to vector<64x128xf32>
    %9 = arith.addf %6, %8 : vector<64x128xf32>
    %c0_11 = arith.constant 0 : index
    %c0_12 = arith.constant 0 : index
    %10 = vector.load %arg10[%c0_11, %c0_12] : memref<64x128xf32, #tpu.memory_space<vmem>>, vector<64x128xf32>
    tpu.vector_store %arg10[%c0_11, %c0_12], %9 {strides = array<i32>} : memref<64x128xf32, #tpu.memory_space<vmem>>, vector<64x128xf32>,
    %c0_i32 = arith.constant 0 : i32
    %c8_i32 = arith.constant 8 : i32
    %11 = arith.muli %c0_i32, %c8_i32 : i32
    %12 = tpu.assume_multiple %11, 8 : i32
    %13 = arith.index_cast %12 : i32 to index
    %c0_13 = arith.constant 0 : index
    %14 = vector.load %arg10[%13, %c0_13] : memref<64x128xf32, #tpu.memory_space<vmem>>, vector<8x128xf32>
    %c0_14 = arith.constant 0 : index
    %c0_15 = arith.constant 0 : index
    %15 = vector.load %arg12[%c0_14, %c0_15] : memref<8x128xf32, #tpu.memory_space<vmem>>, vector<8x128xf32>
    %c0_16 = arith.constant 0 : index
    %c0_17 = arith.constant 0 : index
    %16 = vector.load %arg2[%c0_16, %c0_17] : memref<128x128xf32, #tpu.memory_space<vmem>>, vector<128x128xf32>
    %cst_18 = arith.constant dense<0.000000e+00> : vector<8x128xf32>
    %17 = tpu.matmul %15, %16, %cst_18 {dimension_numbers = #tpu.dot_dimension_numbers<[1], [0], [0], [1], [0, 0, 1, 1], [], []>} : vector<8x128xf32>, vector<128x128xf32>, vector<8x128xf32> -> vector<8x128xf32>
    %18 = arith.addf %14, %17 : vector<8x128xf32>
    %19 = arith.negf %18 : vector<8x128xf32>
    %20 = math.exp %19 : vector<8x128xf32>
    %cst_19 = arith.constant 1.000000e+00 : f32
    %21 = vector.broadcast %cst_19 : f32 to vector<8x128xf32>
    %22 = arith.addf %21, %20 : vector<8x128xf32>
    %23 = arith.divf %21, %22 : vector<8x128xf32>
    %24 = math.tanh %18 : vector<8x128xf32>
    %c96_i32 = arith.constant 96 : i32
    %25 = tpu.dynamic_rotate %23 by %c96_i32 dim 1 : vector<8x128xf32>, i32 -> vector<8x128xf32>
    %c64_i32 = arith.constant 64 : i32
    %26 = tpu.dynamic_rotate %24 by %c64_i32 dim 1 : vector<8x128xf32>, i32 -> vector<8x128xf32>
    %c32_i32 = arith.constant 32 : i32
    %27 = tpu.dynamic_rotate %23 by %c32_i32 dim 1 : vector<8x128xf32>, i32 -> vector<8x128xf32>
    %c0_20 = arith.constant 0 : index
    %c0_21 = arith.constant 0 : index
    %28 = vector.load %arg13[%c0_20, %c0_21] : memref<8x128xf32, #tpu.memory_space<vmem>>, vector<8x128xf32>
    %29 = arith.mulf %25, %28 : vector<8x128xf32>
    %30 = arith.mulf %23, %26 : vector<8x128xf32>
    %31 = arith.addf %29, %30 : vector<8x128xf32>
    %32 = math.tanh %31 : vector<8x128xf32>
    %33 = arith.mulf %27, %32 : vector<8x128xf32>
    %c0_22 = arith.constant 0 : index
    %c0_23 = arith.constant 0 : index
    %34 = vector.load %arg13[%c0_22, %c0_23] : memref<8x128xf32, #tpu.memory_space<vmem>>, vector<8x128xf32>
    tpu.vector_store %arg13[%c0_22, %c0_23], %31 {strides = array<i32>} : memref<8x128xf32, #tpu.memory_space<vmem>>, vector<8x128xf32>,
    %c0_24 = arith.constant 0 : index
    %c0_25 = arith.constant 0 : index
    %35 = vector.load %arg12[%c0_24, %c0_25] : memref<8x128xf32, #tpu.memory_space<vmem>>, vector<8x128xf32>
    tpu.vector_store %arg12[%c0_24, %c0_25], %33 {strides = array<i32>} : memref<8x128xf32, #tpu.memory_space<vmem>>, vector<8x128xf32>,
    %c8_i32_26 = arith.constant 8 : i32
    %36 = arith.muli %c0_i32, %c8_i32_26 : i32
    %c0_i32_27 = arith.constant 0 : i32
    %37 = arith.addi %c0_i32_27, %36 : i32
    %38 = tpu.assume_multiple %37, 8 : i32
    %39 = arith.index_cast %38 : i32 to index
    %c0_28 = arith.constant 0 : index
    %40 = vector.load %arg11[%39, %c0_28] : memref<64x128xf32, #tpu.memory_space<vmem>>, vector<8x128xf32>
    tpu.vector_store %arg11[%39, %c0_28], %33 {strides = array<i32>} : memref<64x128xf32, #tpu.memory_space<vmem>>, vector<8x128xf32>,
    %c1_i32 = arith.constant 1 : i32
    %c8_i32_29 = arith.constant 8 : i32
    %41 = arith.muli %c1_i32, %c8_i32_29 : i32
    %42 = tpu.assume_multiple %41, 8 : i32
    %43 = arith.index_cast %42 : i32 to index
    %c0_30 = arith.constant 0 : index
    %44 = vector.load %arg10[%43, %c0_30] : memref<64x128xf32, #tpu.memory_space<vmem>>, vector<8x128xf32>
    %c0_31 = arith.constant 0 : index
    %c0_32 = arith.constant 0 : index
    %45 = vector.load %arg12[%c0_31, %c0_32] : memref<8x128xf32, #tpu.memory_space<vmem>>, vector<8x128xf32>
    %c0_33 = arith.constant 0 : index
    %c0_34 = arith.constant 0 : index
    %46 = vector.load %arg2[%c0_33, %c0_34] : memref<128x128xf32, #tpu.memory_space<vmem>>, vector<128x128xf32>
    %cst_35 = arith.constant dense<0.000000e+00> : vector<8x128xf32>
    %47 = tpu.matmul %45, %46, %cst_35 {dimension_numbers = #tpu.dot_dimension_numbers<[1], [0], [0], [1], [0, 0, 1, 1], [], []>} : vector<8x128xf32>, vector<128x128xf32>, vector<8x128xf32> -> vector<8x128xf32>
    %48 = arith.addf %44, %47 : vector<8x128xf32>
    %49 = arith.negf %48 : vector<8x128xf32>
    %50 = math.exp %49 : vector<8x128xf32>
    %cst_36 = arith.constant 1.000000e+00 : f32
    %51 = vector.broadcast %cst_36 : f32 to vector<8x128xf32>
    %52 = arith.addf %51, %50 : vector<8x128xf32>
    %53 = arith.divf %51, %52 : vector<8x128xf32>
    %54 = math.tanh %48 : vector<8x128xf32>
    %c96_i32_37 = arith.constant 96 : i32
    %55 = tpu.dynamic_rotate %53 by %c96_i32_37 dim 1 : vector<8x128xf32>, i32 -> vector<8x128xf32>
    %c64_i32_38 = arith.constant 64 : i32
    %56 = tpu.dynamic_rotate %54 by %c64_i32_38 dim 1 : vector<8x128xf32>, i32 -> vector<8x128xf32>
    %c32_i32_39 = arith.constant 32 : i32
    %57 = tpu.dynamic_rotate %53 by %c32_i32_39 dim 1 : vector<8x128xf32>, i32 -> vector<8x128xf32>
    %c0_40 = arith.constant 0 : index
    %c0_41 = arith.constant 0 : index
    %58 = vector.load %arg13[%c0_40, %c0_41] : memref<8x128xf32, #tpu.memory_space<vmem>>, vector<8x128xf32>
    %59 = arith.mulf %55, %58 : vector<8x128xf32>
    %60 = arith.mulf %53, %56 : vector<8x128xf32>
    %61 = arith.addf %59, %60 : vector<8x128xf32>
    %62 = math.tanh %61 : vector<8x128xf32>
    %63 = arith.mulf %57, %62 : vector<8x128xf32>
    %c0_42 = arith.constant 0 : index
    %c0_43 = arith.constant 0 : index
    %64 = vector.load %arg13[%c0_42, %c0_43] : memref<8x128xf32, #tpu.memory_space<vmem>>, vector<8x128xf32>
    tpu.vector_store %arg13[%c0_42, %c0_43], %61 {strides = array<i32>} : memref<8x128xf32, #tpu.memory_space<vmem>>, vector<8x128xf32>,
    %c0_44 = arith.constant 0 : index
    %c0_45 = arith.constant 0 : index
    %65 = vector.load %arg12[%c0_44, %c0_45] : memref<8x128xf32, #tpu.memory_space<vmem>>, vector<8x128xf32>
    tpu.vector_store %arg12[%c0_44, %c0_45], %63 {strides = array<i32>} : memref<8x128xf32, #tpu.memory_space<vmem>>, vector<8x128xf32>,
    %c8_i32_46 = arith.constant 8 : i32
    %66 = arith.muli %c1_i32, %c8_i32_46 : i32
    %c0_i32_47 = arith.constant 0 : i32
    %67 = arith.addi %c0_i32_47, %66 : i32
    %68 = tpu.assume_multiple %67, 8 : i32
    %69 = arith.index_cast %68 : i32 to index
    %c0_48 = arith.constant 0 : index
    %70 = vector.load %arg11[%69, %c0_48] : memref<64x128xf32, #tpu.memory_space<vmem>>, vector<8x128xf32>
    tpu.vector_store %arg11[%69, %c0_48], %63 {strides = array<i32>} : memref<64x128xf32, #tpu.memory_space<vmem>>, vector<8x128xf32>,
    %c2_i32 = arith.constant 2 : i32
    %c8_i32_49 = arith.constant 8 : i32
    %71 = arith.muli %c2_i32, %c8_i32_49 : i32
    %72 = tpu.assume_multiple %71, 8 : i32
    %73 = arith.index_cast %72 : i32 to index
    %c0_50 = arith.constant 0 : index
    %74 = vector.load %arg10[%73, %c0_50] : memref<64x128xf32, #tpu.memory_space<vmem>>, vector<8x128xf32>
    %c0_51 = arith.constant 0 : index
    %c0_52 = arith.constant 0 : index
    %75 = vector.load %arg12[%c0_51, %c0_52] : memref<8x128xf32, #tpu.memory_space<vmem>>, vector<8x128xf32>
    %c0_53 = arith.constant 0 : index
    %c0_54 = arith.constant 0 : index
    %76 = vector.load %arg2[%c0_53, %c0_54] : memref<128x128xf32, #tpu.memory_space<vmem>>, vector<128x128xf32>
    %cst_55 = arith.constant dense<0.000000e+00> : vector<8x128xf32>
    %77 = tpu.matmul %75, %76, %cst_55 {dimension_numbers = #tpu.dot_dimension_numbers<[1], [0], [0], [1], [0, 0, 1, 1], [], []>} : vector<8x128xf32>, vector<128x128xf32>, vector<8x128xf32> -> vector<8x128xf32>
    %78 = arith.addf %74, %77 : vector<8x128xf32>
    %79 = arith.negf %78 : vector<8x128xf32>
    %80 = math.exp %79 : vector<8x128xf32>
    %cst_56 = arith.constant 1.000000e+00 : f32
    %81 = vector.broadcast %cst_56 : f32 to vector<8x128xf32>
    %82 = arith.addf %81, %80 : vector<8x128xf32>
    %83 = arith.divf %81, %82 : vector<8x128xf32>
    %84 = math.tanh %78 : vector<8x128xf32>
    %c96_i32_57 = arith.constant 96 : i32
    %85 = tpu.dynamic_rotate %83 by %c96_i32_57 dim 1 : vector<8x128xf32>, i32 -> vector<8x128xf32>
    %c64_i32_58 = arith.constant 64 : i32
    %86 = tpu.dynamic_rotate %84 by %c64_i32_58 dim 1 : vector<8x128xf32>, i32 -> vector<8x128xf32>
    %c32_i32_59 = arith.constant 32 : i32
    %87 = tpu.dynamic_rotate %83 by %c32_i32_59 dim 1 : vector<8x128xf32>, i32 -> vector<8x128xf32>
    %c0_60 = arith.constant 0 : index
    %c0_61 = arith.constant 0 : index
    %88 = vector.load %arg13[%c0_60, %c0_61] : memref<8x128xf32, #tpu.memory_space<vmem>>, vector<8x128xf32>
    %89 = arith.mulf %85, %88 : vector<8x128xf32>
    %90 = arith.mulf %83, %86 : vector<8x128xf32>
    %91 = arith.addf %89, %90 : vector<8x128xf32>
    %92 = math.tanh %91 : vector<8x128xf32>
    %93 = arith.mulf %87, %92 : vector<8x128xf32>
    %c0_62 = arith.constant 0 : index
    %c0_63 = arith.constant 0 : index
    %94 = vector.load %arg13[%c0_62, %c0_63] : memref<8x128xf32, #tpu.memory_space<vmem>>, vector<8x128xf32>
    tpu.vector_store %arg13[%c0_62, %c0_63], %91 {strides = array<i32>} : memref<8x128xf32, #tpu.memory_space<vmem>>, vector<8x128xf32>,
    %c0_64 = arith.constant 0 : index
    %c0_65 = arith.constant 0 : index
    %95 = vector.load %arg12[%c0_64, %c0_65] : memref<8x128xf32, #tpu.memory_space<vmem>>, vector<8x128xf32>
    tpu.vector_store %arg12[%c0_64, %c0_65], %93 {strides = array<i32>} : memref<8x128xf32, #tpu.memory_space<vmem>>, vector<8x128xf32>,
    %c8_i32_66 = arith.constant 8 : i32
    %96 = arith.muli %c2_i32, %c8_i32_66 : i32
    %c0_i32_67 = arith.constant 0 : i32
    %97 = arith.addi %c0_i32_67, %96 : i32
    %98 = tpu.assume_multiple %97, 8 : i32
    %99 = arith.index_cast %98 : i32 to index
    %c0_68 = arith.constant 0 : index
    %100 = vector.load %arg11[%99, %c0_68] : memref<64x128xf32, #tpu.memory_space<vmem>>, vector<8x128xf32>
    tpu.vector_store %arg11[%99, %c0_68], %93 {strides = array<i32>} : memref<64x128xf32, #tpu.memory_space<vmem>>, vector<8x128xf32>,
    %c3_i32 = arith.constant 3 : i32
    %c8_i32_69 = arith.constant 8 : i32
    %101 = arith.muli %c3_i32, %c8_i32_69 : i32
    %102 = tpu.assume_multiple %101, 8 : i32
    %103 = arith.index_cast %102 : i32 to index
    %c0_70 = arith.constant 0 : index
    %104 = vector.load %arg10[%103, %c0_70] : memref<64x128xf32, #tpu.memory_space<vmem>>, vector<8x128xf32>
    %c0_71 = arith.constant 0 : index
    %c0_72 = arith.constant 0 : index
    %105 = vector.load %arg12[%c0_71, %c0_72] : memref<8x128xf32, #tpu.memory_space<vmem>>, vector<8x128xf32>
    %c0_73 = arith.constant 0 : index
    %c0_74 = arith.constant 0 : index
    %106 = vector.load %arg2[%c0_73, %c0_74] : memref<128x128xf32, #tpu.memory_space<vmem>>, vector<128x128xf32>
    %cst_75 = arith.constant dense<0.000000e+00> : vector<8x128xf32>
    %107 = tpu.matmul %105, %106, %cst_75 {dimension_numbers = #tpu.dot_dimension_numbers<[1], [0], [0], [1], [0, 0, 1, 1], [], []>} : vector<8x128xf32>, vector<128x128xf32>, vector<8x128xf32> -> vector<8x128xf32>
    %108 = arith.addf %104, %107 : vector<8x128xf32>
    %109 = arith.negf %108 : vector<8x128xf32>
    %110 = math.exp %109 : vector<8x128xf32>
    %cst_76 = arith.constant 1.000000e+00 : f32
    %111 = vector.broadcast %cst_76 : f32 to vector<8x128xf32>
    %112 = arith.addf %111, %110 : vector<8x128xf32>
    %113 = arith.divf %111, %112 : vector<8x128xf32>
    %114 = math.tanh %108 : vector<8x128xf32>
    %c96_i32_77 = arith.constant 96 : i32
    %115 = tpu.dynamic_rotate %113 by %c96_i32_77 dim 1 : vector<8x128xf32>, i32 -> vector<8x128xf32>
    %c64_i32_78 = arith.constant 64 : i32
    %116 = tpu.dynamic_rotate %114 by %c64_i32_78 dim 1 : vector<8x128xf32>, i32 -> vector<8x128xf32>
    %c32_i32_79 = arith.constant 32 : i32
    %117 = tpu.dynamic_rotate %113 by %c32_i32_79 dim 1 : vector<8x128xf32>, i32 -> vector<8x128xf32>
    %c0_80 = arith.constant 0 : index
    %c0_81 = arith.constant 0 : index
    %118 = vector.load %arg13[%c0_80, %c0_81] : memref<8x128xf32, #tpu.memory_space<vmem>>, vector<8x128xf32>
    %119 = arith.mulf %115, %118 : vector<8x128xf32>
    %120 = arith.mulf %113, %116 : vector<8x128xf32>
    %121 = arith.addf %119, %120 : vector<8x128xf32>
    %122 = math.tanh %121 : vector<8x128xf32>
    %123 = arith.mulf %117, %122 : vector<8x128xf32>
    %c0_82 = arith.constant 0 : index
    %c0_83 = arith.constant 0 : index
    %124 = vector.load %arg13[%c0_82, %c0_83] : memref<8x128xf32, #tpu.memory_space<vmem>>, vector<8x128xf32>
    tpu.vector_store %arg13[%c0_82, %c0_83], %121 {strides = array<i32>} : memref<8x128xf32, #tpu.memory_space<vmem>>, vector<8x128xf32>,
    %c0_84 = arith.constant 0 : index
    %c0_85 = arith.constant 0 : index
    %125 = vector.load %arg12[%c0_84, %c0_85] : memref<8x128xf32, #tpu.memory_space<vmem>>, vector<8x128xf32>
    tpu.vector_store %arg12[%c0_84, %c0_85], %123 {strides = array<i32>} : memref<8x128xf32, #tpu.memory_space<vmem>>, vector<8x128xf32>,
    %c8_i32_86 = arith.constant 8 : i32
    %126 = arith.muli %c3_i32, %c8_i32_86 : i32
    %c0_i32_87 = arith.constant 0 : i32
    %127 = arith.addi %c0_i32_87, %126 : i32
    %128 = tpu.assume_multiple %127, 8 : i32
    %129 = arith.index_cast %128 : i32 to index
    %c0_88 = arith.constant 0 : index
    %130 = vector.load %arg11[%129, %c0_88] : memref<64x128xf32, #tpu.memory_space<vmem>>, vector<8x128xf32>
    tpu.vector_store %arg11[%129, %c0_88], %123 {strides = array<i32>} : memref<64x128xf32, #tpu.memory_space<vmem>>, vector<8x128xf32>,
    %c4_i32 = arith.constant 4 : i32
    %c8_i32_89 = arith.constant 8 : i32
    %131 = arith.muli %c4_i32, %c8_i32_89 : i32
    %132 = tpu.assume_multiple %131, 8 : i32
    %133 = arith.index_cast %132 : i32 to index
    %c0_90 = arith.constant 0 : index
    %134 = vector.load %arg10[%133, %c0_90] : memref<64x128xf32, #tpu.memory_space<vmem>>, vector<8x128xf32>
    %c0_91 = arith.constant 0 : index
    %c0_92 = arith.constant 0 : index
    %135 = vector.load %arg12[%c0_91, %c0_92] : memref<8x128xf32, #tpu.memory_space<vmem>>, vector<8x128xf32>
    %c0_93 = arith.constant 0 : index
    %c0_94 = arith.constant 0 : index
    %136 = vector.load %arg2[%c0_93, %c0_94] : memref<128x128xf32, #tpu.memory_space<vmem>>, vector<128x128xf32>
    %cst_95 = arith.constant dense<0.000000e+00> : vector<8x128xf32>
    %137 = tpu.matmul %135, %136, %cst_95 {dimension_numbers = #tpu.dot_dimension_numbers<[1], [0], [0], [1], [0, 0, 1, 1], [], []>} : vector<8x128xf32>, vector<128x128xf32>, vector<8x128xf32> -> vector<8x128xf32>
    %138 = arith.addf %134, %137 : vector<8x128xf32>
    %139 = arith.negf %138 : vector<8x128xf32>
    %140 = math.exp %139 : vector<8x128xf32>
    %cst_96 = arith.constant 1.000000e+00 : f32
    %141 = vector.broadcast %cst_96 : f32 to vector<8x128xf32>
    %142 = arith.addf %141, %140 : vector<8x128xf32>
    %143 = arith.divf %141, %142 : vector<8x128xf32>
    %144 = math.tanh %138 : vector<8x128xf32>
    %c96_i32_97 = arith.constant 96 : i32
    %145 = tpu.dynamic_rotate %143 by %c96_i32_97 dim 1 : vector<8x128xf32>, i32 -> vector<8x128xf32>
    %c64_i32_98 = arith.constant 64 : i32
    %146 = tpu.dynamic_rotate %144 by %c64_i32_98 dim 1 : vector<8x128xf32>, i32 -> vector<8x128xf32>
    %c32_i32_99 = arith.constant 32 : i32
    %147 = tpu.dynamic_rotate %143 by %c32_i32_99 dim 1 : vector<8x128xf32>, i32 -> vector<8x128xf32>
    %c0_100 = arith.constant 0 : index
    %c0_101 = arith.constant 0 : index
    %148 = vector.load %arg13[%c0_100, %c0_101] : memref<8x128xf32, #tpu.memory_space<vmem>>, vector<8x128xf32>
    %149 = arith.mulf %145, %148 : vector<8x128xf32>
    %150 = arith.mulf %143, %146 : vector<8x128xf32>
    %151 = arith.addf %149, %150 : vector<8x128xf32>
    %152 = math.tanh %151 : vector<8x128xf32>
    %153 = arith.mulf %147, %152 : vector<8x128xf32>
    %c0_102 = arith.constant 0 : index
    %c0_103 = arith.constant 0 : index
    %154 = vector.load %arg13[%c0_102, %c0_103] : memref<8x128xf32, #tpu.memory_space<vmem>>, vector<8x128xf32>
    tpu.vector_store %arg13[%c0_102, %c0_103], %151 {strides = array<i32>} : memref<8x128xf32, #tpu.memory_space<vmem>>, vector<8x128xf32>,
    %c0_104 = arith.constant 0 : index
    %c0_105 = arith.constant 0 : index
    %155 = vector.load %arg12[%c0_104, %c0_105] : memref<8x128xf32, #tpu.memory_space<vmem>>, vector<8x128xf32>
    tpu.vector_store %arg12[%c0_104, %c0_105], %153 {strides = array<i32>} : memref<8x128xf32, #tpu.memory_space<vmem>>, vector<8x128xf32>,
    %c8_i32_106 = arith.constant 8 : i32
    %156 = arith.muli %c4_i32, %c8_i32_106 : i32
    %c0_i32_107 = arith.constant 0 : i32
    %157 = arith.addi %c0_i32_107, %156 : i32
    %158 = tpu.assume_multiple %157, 8 : i32
    %159 = arith.index_cast %158 : i32 to index
    %c0_108 = arith.constant 0 : index
    %160 = vector.load %arg11[%159, %c0_108] : memref<64x128xf32, #tpu.memory_space<vmem>>, vector<8x128xf32>
    tpu.vector_store %arg11[%159, %c0_108], %153 {strides = array<i32>} : memref<64x128xf32, #tpu.memory_space<vmem>>, vector<8x128xf32>,
    %c5_i32 = arith.constant 5 : i32
    %c8_i32_109 = arith.constant 8 : i32
    %161 = arith.muli %c5_i32, %c8_i32_109 : i32
    %162 = tpu.assume_multiple %161, 8 : i32
    %163 = arith.index_cast %162 : i32 to index
    %c0_110 = arith.constant 0 : index
    %164 = vector.load %arg10[%163, %c0_110] : memref<64x128xf32, #tpu.memory_space<vmem>>, vector<8x128xf32>
    %c0_111 = arith.constant 0 : index
    %c0_112 = arith.constant 0 : index
    %165 = vector.load %arg12[%c0_111, %c0_112] : memref<8x128xf32, #tpu.memory_space<vmem>>, vector<8x128xf32>
    %c0_113 = arith.constant 0 : index
    %c0_114 = arith.constant 0 : index
    %166 = vector.load %arg2[%c0_113, %c0_114] : memref<128x128xf32, #tpu.memory_space<vmem>>, vector<128x128xf32>
    %cst_115 = arith.constant dense<0.000000e+00> : vector<8x128xf32>
    %167 = tpu.matmul %165, %166, %cst_115 {dimension_numbers = #tpu.dot_dimension_numbers<[1], [0], [0], [1], [0, 0, 1, 1], [], []>} : vector<8x128xf32>, vector<128x128xf32>, vector<8x128xf32> -> vector<8x128xf32>
    %168 = arith.addf %164, %167 : vector<8x128xf32>
    %169 = arith.negf %168 : vector<8x128xf32>
    %170 = math.exp %169 : vector<8x128xf32>
    %cst_116 = arith.constant 1.000000e+00 : f32
    %171 = vector.broadcast %cst_116 : f32 to vector<8x128xf32>
    %172 = arith.addf %171, %170 : vector<8x128xf32>
    %173 = arith.divf %171, %172 : vector<8x128xf32>
    %174 = math.tanh %168 : vector<8x128xf32>
    %c96_i32_117 = arith.constant 96 : i32
    %175 = tpu.dynamic_rotate %173 by %c96_i32_117 dim 1 : vector<8x128xf32>, i32 -> vector<8x128xf32>
    %c64_i32_118 = arith.constant 64 : i32
    %176 = tpu.dynamic_rotate %174 by %c64_i32_118 dim 1 : vector<8x128xf32>, i32 -> vector<8x128xf32>
    %c32_i32_119 = arith.constant 32 : i32
    %177 = tpu.dynamic_rotate %173 by %c32_i32_119 dim 1 : vector<8x128xf32>, i32 -> vector<8x128xf32>
    %c0_120 = arith.constant 0 : index
    %c0_121 = arith.constant 0 : index
    %178 = vector.load %arg13[%c0_120, %c0_121] : memref<8x128xf32, #tpu.memory_space<vmem>>, vector<8x128xf32>
    %179 = arith.mulf %175, %178 : vector<8x128xf32>
    %180 = arith.mulf %173, %176 : vector<8x128xf32>
    %181 = arith.addf %179, %180 : vector<8x128xf32>
    %182 = math.tanh %181 : vector<8x128xf32>
    %183 = arith.mulf %177, %182 : vector<8x128xf32>
    %c0_122 = arith.constant 0 : index
    %c0_123 = arith.constant 0 : index
    %184 = vector.load %arg13[%c0_122, %c0_123] : memref<8x128xf32, #tpu.memory_space<vmem>>, vector<8x128xf32>
    tpu.vector_store %arg13[%c0_122, %c0_123], %181 {strides = array<i32>} : memref<8x128xf32, #tpu.memory_space<vmem>>, vector<8x128xf32>,
    %c0_124 = arith.constant 0 : index
    %c0_125 = arith.constant 0 : index
    %185 = vector.load %arg12[%c0_124, %c0_125] : memref<8x128xf32, #tpu.memory_space<vmem>>, vector<8x128xf32>
    tpu.vector_store %arg12[%c0_124, %c0_125], %183 {strides = array<i32>} : memref<8x128xf32, #tpu.memory_space<vmem>>, vector<8x128xf32>,
    %c8_i32_126 = arith.constant 8 : i32
    %186 = arith.muli %c5_i32, %c8_i32_126 : i32
    %c0_i32_127 = arith.constant 0 : i32
    %187 = arith.addi %c0_i32_127, %186 : i32
    %188 = tpu.assume_multiple %187, 8 : i32
    %189 = arith.index_cast %188 : i32 to index
    %c0_128 = arith.constant 0 : index
    %190 = vector.load %arg11[%189, %c0_128] : memref<64x128xf32, #tpu.memory_space<vmem>>, vector<8x128xf32>
    tpu.vector_store %arg11[%189, %c0_128], %183 {strides = array<i32>} : memref<64x128xf32, #tpu.memory_space<vmem>>, vector<8x128xf32>,
    %c6_i32 = arith.constant 6 : i32
    %c8_i32_129 = arith.constant 8 : i32
    %191 = arith.muli %c6_i32, %c8_i32_129 : i32
    %192 = tpu.assume_multiple %191, 8 : i32
    %193 = arith.index_cast %192 : i32 to index
    %c0_130 = arith.constant 0 : index
    %194 = vector.load %arg10[%193, %c0_130] : memref<64x128xf32, #tpu.memory_space<vmem>>, vector<8x128xf32>
    %c0_131 = arith.constant 0 : index
    %c0_132 = arith.constant 0 : index
    %195 = vector.load %arg12[%c0_131, %c0_132] : memref<8x128xf32, #tpu.memory_space<vmem>>, vector<8x128xf32>
    %c0_133 = arith.constant 0 : index
    %c0_134 = arith.constant 0 : index
    %196 = vector.load %arg2[%c0_133, %c0_134] : memref<128x128xf32, #tpu.memory_space<vmem>>, vector<128x128xf32>
    %cst_135 = arith.constant dense<0.000000e+00> : vector<8x128xf32>
    %197 = tpu.matmul %195, %196, %cst_135 {dimension_numbers = #tpu.dot_dimension_numbers<[1], [0], [0], [1], [0, 0, 1, 1], [], []>} : vector<8x128xf32>, vector<128x128xf32>, vector<8x128xf32> -> vector<8x128xf32>
    %198 = arith.addf %194, %197 : vector<8x128xf32>
    %199 = arith.negf %198 : vector<8x128xf32>
    %200 = math.exp %199 : vector<8x128xf32>
    %cst_136 = arith.constant 1.000000e+00 : f32
    %201 = vector.broadcast %cst_136 : f32 to vector<8x128xf32>
    %202 = arith.addf %201, %200 : vector<8x128xf32>
    %203 = arith.divf %201, %202 : vector<8x128xf32>
    %204 = math.tanh %198 : vector<8x128xf32>
    %c96_i32_137 = arith.constant 96 : i32
    %205 = tpu.dynamic_rotate %203 by %c96_i32_137 dim 1 : vector<8x128xf32>, i32 -> vector<8x128xf32>
    %c64_i32_138 = arith.constant 64 : i32
    %206 = tpu.dynamic_rotate %204 by %c64_i32_138 dim 1 : vector<8x128xf32>, i32 -> vector<8x128xf32>
    %c32_i32_139 = arith.constant 32 : i32
    %207 = tpu.dynamic_rotate %203 by %c32_i32_139 dim 1 : vector<8x128xf32>, i32 -> vector<8x128xf32>
    %c0_140 = arith.constant 0 : index
    %c0_141 = arith.constant 0 : index
    %208 = vector.load %arg13[%c0_140, %c0_141] : memref<8x128xf32, #tpu.memory_space<vmem>>, vector<8x128xf32>
    %209 = arith.mulf %205, %208 : vector<8x128xf32>
    %210 = arith.mulf %203, %206 : vector<8x128xf32>
    %211 = arith.addf %209, %210 : vector<8x128xf32>
    %212 = math.tanh %211 : vector<8x128xf32>
    %213 = arith.mulf %207, %212 : vector<8x128xf32>
    %c0_142 = arith.constant 0 : index
    %c0_143 = arith.constant 0 : index
    %214 = vector.load %arg13[%c0_142, %c0_143] : memref<8x128xf32, #tpu.memory_space<vmem>>, vector<8x128xf32>
    tpu.vector_store %arg13[%c0_142, %c0_143], %211 {strides = array<i32>} : memref<8x128xf32, #tpu.memory_space<vmem>>, vector<8x128xf32>,
    %c0_144 = arith.constant 0 : index
    %c0_145 = arith.constant 0 : index
    %215 = vector.load %arg12[%c0_144, %c0_145] : memref<8x128xf32, #tpu.memory_space<vmem>>, vector<8x128xf32>
    tpu.vector_store %arg12[%c0_144, %c0_145], %213 {strides = array<i32>} : memref<8x128xf32, #tpu.memory_space<vmem>>, vector<8x128xf32>,
    %c8_i32_146 = arith.constant 8 : i32
    %216 = arith.muli %c6_i32, %c8_i32_146 : i32
    %c0_i32_147 = arith.constant 0 : i32
    %217 = arith.addi %c0_i32_147, %216 : i32
    %218 = tpu.assume_multiple %217, 8 : i32
    %219 = arith.index_cast %218 : i32 to index
    %c0_148 = arith.constant 0 : index
    %220 = vector.load %arg11[%219, %c0_148] : memref<64x128xf32, #tpu.memory_space<vmem>>, vector<8x128xf32>
    tpu.vector_store %arg11[%219, %c0_148], %213 {strides = array<i32>} : memref<64x128xf32, #tpu.memory_space<vmem>>, vector<8x128xf32>,
    %c7_i32 = arith.constant 7 : i32
    %c8_i32_149 = arith.constant 8 : i32
    %221 = arith.muli %c7_i32, %c8_i32_149 : i32
    %222 = tpu.assume_multiple %221, 8 : i32
    %223 = arith.index_cast %222 : i32 to index
    %c0_150 = arith.constant 0 : index
    %224 = vector.load %arg10[%223, %c0_150] : memref<64x128xf32, #tpu.memory_space<vmem>>, vector<8x128xf32>
    %c0_151 = arith.constant 0 : index
    %c0_152 = arith.constant 0 : index
    %225 = vector.load %arg12[%c0_151, %c0_152] : memref<8x128xf32, #tpu.memory_space<vmem>>, vector<8x128xf32>
    %c0_153 = arith.constant 0 : index
    %c0_154 = arith.constant 0 : index
    %226 = vector.load %arg2[%c0_153, %c0_154] : memref<128x128xf32, #tpu.memory_space<vmem>>, vector<128x128xf32>
    %cst_155 = arith.constant dense<0.000000e+00> : vector<8x128xf32>
    %227 = tpu.matmul %225, %226, %cst_155 {dimension_numbers = #tpu.dot_dimension_numbers<[1], [0], [0], [1], [0, 0, 1, 1], [], []>} : vector<8x128xf32>, vector<128x128xf32>, vector<8x128xf32> -> vector<8x128xf32>
    %228 = arith.addf %224, %227 : vector<8x128xf32>
    %229 = arith.negf %228 : vector<8x128xf32>
    %230 = math.exp %229 : vector<8x128xf32>
    %cst_156 = arith.constant 1.000000e+00 : f32
    %231 = vector.broadcast %cst_156 : f32 to vector<8x128xf32>
    %232 = arith.addf %231, %230 : vector<8x128xf32>
    %233 = arith.divf %231, %232 : vector<8x128xf32>
    %234 = math.tanh %228 : vector<8x128xf32>
    %c96_i32_157 = arith.constant 96 : i32
    %235 = tpu.dynamic_rotate %233 by %c96_i32_157 dim 1 : vector<8x128xf32>, i32 -> vector<8x128xf32>
    %c64_i32_158 = arith.constant 64 : i32
    %236 = tpu.dynamic_rotate %234 by %c64_i32_158 dim 1 : vector<8x128xf32>, i32 -> vector<8x128xf32>
    %c32_i32_159 = arith.constant 32 : i32
    %237 = tpu.dynamic_rotate %233 by %c32_i32_159 dim 1 : vector<8x128xf32>, i32 -> vector<8x128xf32>
    %c0_160 = arith.constant 0 : index
    %c0_161 = arith.constant 0 : index
    %238 = vector.load %arg13[%c0_160, %c0_161] : memref<8x128xf32, #tpu.memory_space<vmem>>, vector<8x128xf32>
    %239 = arith.mulf %235, %238 : vector<8x128xf32>
    %240 = arith.mulf %233, %236 : vector<8x128xf32>
    %241 = arith.addf %239, %240 : vector<8x128xf32>
    %242 = math.tanh %241 : vector<8x128xf32>
    %243 = arith.mulf %237, %242 : vector<8x128xf32>
    %c0_162 = arith.constant 0 : index
    %c0_163 = arith.constant 0 : index
    %244 = vector.load %arg13[%c0_162, %c0_163] : memref<8x128xf32, #tpu.memory_space<vmem>>, vector<8x128xf32>
    tpu.vector_store %arg13[%c0_162, %c0_163], %241 {strides = array<i32>} : memref<8x128xf32, #tpu.memory_space<vmem>>, vector<8x128xf32>,
    %c0_164 = arith.constant 0 : index
    %c0_165 = arith.constant 0 : index
    %245 = vector.load %arg12[%c0_164, %c0_165] : memref<8x128xf32, #tpu.memory_space<vmem>>, vector<8x128xf32>
    tpu.vector_store %arg12[%c0_164, %c0_165], %243 {strides = array<i32>} : memref<8x128xf32, #tpu.memory_space<vmem>>, vector<8x128xf32>,
    %c8_i32_166 = arith.constant 8 : i32
    %246 = arith.muli %c7_i32, %c8_i32_166 : i32
    %c0_i32_167 = arith.constant 0 : i32
    %247 = arith.addi %c0_i32_167, %246 : i32
    %248 = tpu.assume_multiple %247, 8 : i32
    %249 = arith.index_cast %248 : i32 to index
    %c0_168 = arith.constant 0 : index
    %250 = vector.load %arg11[%249, %c0_168] : memref<64x128xf32, #tpu.memory_space<vmem>>, vector<8x128xf32>
    tpu.vector_store %arg11[%249, %c0_168], %243 {strides = array<i32>} : memref<64x128xf32, #tpu.memory_space<vmem>>, vector<8x128xf32>,
    %c8_i32_169 = arith.constant 8 : i32
    %cst_170 = arith.constant 0.000000e+00 : f32
    %251 = vector.broadcast %cst_170 : f32 to vector<8x128xf32>
    %c0_171 = arith.constant 0 : index
    %c0_172 = arith.constant 0 : index
    %252 = vector.load %arg12[%c0_171, %c0_172] : memref<8x128xf32, #tpu.memory_space<vmem>>, vector<8x128xf32>
    tpu.vector_store %arg12[%c0_171, %c0_172], %251 {strides = array<i32>} : memref<8x128xf32, #tpu.memory_space<vmem>>, vector<8x128xf32>,
    %cst_173 = arith.constant 0.000000e+00 : f32
    %253 = vector.broadcast %cst_173 : f32 to vector<8x128xf32>
    %c0_174 = arith.constant 0 : index
    %c0_175 = arith.constant 0 : index
    %254 = vector.load %arg13[%c0_174, %c0_175] : memref<8x128xf32, #tpu.memory_space<vmem>>, vector<8x128xf32>
    tpu.vector_store %arg13[%c0_174, %c0_175], %253 {strides = array<i32>} : memref<8x128xf32, #tpu.memory_space<vmem>>, vector<8x128xf32>,
    %c0_176 = arith.constant 0 : index
    %c0_177 = arith.constant 0 : index
    %255 = vector.load %arg11[%c0_176, %c0_177] : memref<64x128xf32, #tpu.memory_space<vmem>>, vector<64x128xf32>
    %c0_178 = arith.constant 0 : index
    %c0_179 = arith.constant 0 : index
    %256 = vector.load %arg4[%c0_178, %c0_179] : memref<128x128xf32, #tpu.memory_space<vmem>>, vector<128x128xf32>
    %cst_180 = arith.constant dense<0.000000e+00> : vector<64x128xf32>
    %257 = tpu.matmul %255, %256, %cst_180 {dimension_numbers = #tpu.dot_dimension_numbers<[1], [0], [0], [1], [0, 0, 1, 1], [], []>} : vector<64x128xf32>, vector<128x128xf32>, vector<64x128xf32> -> vector<64x128xf32>
    %c0_181 = arith.constant 0 : index
    %c0_182 = arith.constant 0 : index
    %258 = vector.load %arg6[%c0_181, %c0_182] : memref<1x128xf32, #tpu.memory_space<vmem>>, vector<1x128xf32>
    %259 = vector.broadcast %258 : vector<1x128xf32> to vector<64x128xf32>
    %260 = arith.addf %257, %259 : vector<64x128xf32>
    %c0_183 = arith.constant 0 : index
    %c0_184 = arith.constant 0 : index
    %261 = vector.load %arg10[%c0_183, %c0_184] : memref<64x128xf32, #tpu.memory_space<vmem>>, vector<64x128xf32>
    tpu.vector_store %arg10[%c0_183, %c0_184], %260 {strides = array<i32>} : memref<64x128xf32, #tpu.memory_space<vmem>>, vector<64x128xf32>,
    %c0_i32_185 = arith.constant 0 : i32
    %c8_i32_186 = arith.constant 8 : i32
    %262 = arith.muli %c0_i32_185, %c8_i32_186 : i32
    %263 = tpu.assume_multiple %262, 8 : i32
    %264 = arith.index_cast %263 : i32 to index
    %c0_187 = arith.constant 0 : index
    %265 = vector.load %arg10[%264, %c0_187] : memref<64x128xf32, #tpu.memory_space<vmem>>, vector<8x128xf32>
    %c0_188 = arith.constant 0 : index
    %c0_189 = arith.constant 0 : index
    %266 = vector.load %arg12[%c0_188, %c0_189] : memref<8x128xf32, #tpu.memory_space<vmem>>, vector<8x128xf32>
    %c0_190 = arith.constant 0 : index
    %c0_191 = arith.constant 0 : index
    %267 = vector.load %arg5[%c0_190, %c0_191] : memref<128x128xf32, #tpu.memory_space<vmem>>, vector<128x128xf32>
    %cst_192 = arith.constant dense<0.000000e+00> : vector<8x128xf32>
    %268 = tpu.matmul %266, %267, %cst_192 {dimension_numbers = #tpu.dot_dimension_numbers<[1], [0], [0], [1], [0, 0, 1, 1], [], []>} : vector<8x128xf32>, vector<128x128xf32>, vector<8x128xf32> -> vector<8x128xf32>
    %269 = arith.addf %265, %268 : vector<8x128xf32>
    %270 = arith.negf %269 : vector<8x128xf32>
    %271 = math.exp %270 : vector<8x128xf32>
    %cst_193 = arith.constant 1.000000e+00 : f32
    %272 = vector.broadcast %cst_193 : f32 to vector<8x128xf32>
    %273 = arith.addf %272, %271 : vector<8x128xf32>
    %274 = arith.divf %272, %273 : vector<8x128xf32>
    %275 = math.tanh %269 : vector<8x128xf32>
    %c96_i32_194 = arith.constant 96 : i32
    %276 = tpu.dynamic_rotate %274 by %c96_i32_194 dim 1 : vector<8x128xf32>, i32 -> vector<8x128xf32>
    %c64_i32_195 = arith.constant 64 : i32
    %277 = tpu.dynamic_rotate %275 by %c64_i32_195 dim 1 : vector<8x128xf32>, i32 -> vector<8x128xf32>
    %c32_i32_196 = arith.constant 32 : i32
    %278 = tpu.dynamic_rotate %274 by %c32_i32_196 dim 1 : vector<8x128xf32>, i32 -> vector<8x128xf32>
    %c0_197 = arith.constant 0 : index
    %c0_198 = arith.constant 0 : index
    %279 = vector.load %arg13[%c0_197, %c0_198] : memref<8x128xf32, #tpu.memory_space<vmem>>, vector<8x128xf32>
    %280 = arith.mulf %276, %279 : vector<8x128xf32>
    %281 = arith.mulf %274, %277 : vector<8x128xf32>
    %282 = arith.addf %280, %281 : vector<8x128xf32>
    %283 = math.tanh %282 : vector<8x128xf32>
    %284 = arith.mulf %278, %283 : vector<8x128xf32>
    %c0_199 = arith.constant 0 : index
    %c0_200 = arith.constant 0 : index
    %285 = vector.load %arg13[%c0_199, %c0_200] : memref<8x128xf32, #tpu.memory_space<vmem>>, vector<8x128xf32>
    tpu.vector_store %arg13[%c0_199, %c0_200], %282 {strides = array<i32>} : memref<8x128xf32, #tpu.memory_space<vmem>>, vector<8x128xf32>,
    %c0_201 = arith.constant 0 : index
    %c0_202 = arith.constant 0 : index
    %286 = vector.load %arg12[%c0_201, %c0_202] : memref<8x128xf32, #tpu.memory_space<vmem>>, vector<8x128xf32>
    tpu.vector_store %arg12[%c0_201, %c0_202], %284 {strides = array<i32>} : memref<8x128xf32, #tpu.memory_space<vmem>>, vector<8x128xf32>,
    %c1_i32_203 = arith.constant 1 : i32
    %c8_i32_204 = arith.constant 8 : i32
    %287 = arith.muli %c1_i32_203, %c8_i32_204 : i32
    %288 = tpu.assume_multiple %287, 8 : i32
    %289 = arith.index_cast %288 : i32 to index
    %c0_205 = arith.constant 0 : index
    %290 = vector.load %arg10[%289, %c0_205] : memref<64x128xf32, #tpu.memory_space<vmem>>, vector<8x128xf32>
    %c0_206 = arith.constant 0 : index
    %c0_207 = arith.constant 0 : index
    %291 = vector.load %arg12[%c0_206, %c0_207] : memref<8x128xf32, #tpu.memory_space<vmem>>, vector<8x128xf32>
    %c0_208 = arith.constant 0 : index
    %c0_209 = arith.constant 0 : index
    %292 = vector.load %arg5[%c0_208, %c0_209] : memref<128x128xf32, #tpu.memory_space<vmem>>, vector<128x128xf32>
    %cst_210 = arith.constant dense<0.000000e+00> : vector<8x128xf32>
    %293 = tpu.matmul %291, %292, %cst_210 {dimension_numbers = #tpu.dot_dimension_numbers<[1], [0], [0], [1], [0, 0, 1, 1], [], []>} : vector<8x128xf32>, vector<128x128xf32>, vector<8x128xf32> -> vector<8x128xf32>
    %294 = arith.addf %290, %293 : vector<8x128xf32>
    %295 = arith.negf %294 : vector<8x128xf32>
    %296 = math.exp %295 : vector<8x128xf32>
    %cst_211 = arith.constant 1.000000e+00 : f32
    %297 = vector.broadcast %cst_211 : f32 to vector<8x128xf32>
    %298 = arith.addf %297, %296 : vector<8x128xf32>
    %299 = arith.divf %297, %298 : vector<8x128xf32>
    %300 = math.tanh %294 : vector<8x128xf32>
    %c96_i32_212 = arith.constant 96 : i32
    %301 = tpu.dynamic_rotate %299 by %c96_i32_212 dim 1 : vector<8x128xf32>, i32 -> vector<8x128xf32>
    %c64_i32_213 = arith.constant 64 : i32
    %302 = tpu.dynamic_rotate %300 by %c64_i32_213 dim 1 : vector<8x128xf32>, i32 -> vector<8x128xf32>
    %c32_i32_214 = arith.constant 32 : i32
    %303 = tpu.dynamic_rotate %299 by %c32_i32_214 dim 1 : vector<8x128xf32>, i32 -> vector<8x128xf32>
    %c0_215 = arith.constant 0 : index
    %c0_216 = arith.constant 0 : index
    %304 = vector.load %arg13[%c0_215, %c0_216] : memref<8x128xf32, #tpu.memory_space<vmem>>, vector<8x128xf32>
    %305 = arith.mulf %301, %304 : vector<8x128xf32>
    %306 = arith.mulf %299, %302 : vector<8x128xf32>
    %307 = arith.addf %305, %306 : vector<8x128xf32>
    %308 = math.tanh %307 : vector<8x128xf32>
    %309 = arith.mulf %303, %308 : vector<8x128xf32>
    %c0_217 = arith.constant 0 : index
    %c0_218 = arith.constant 0 : index
    %310 = vector.load %arg13[%c0_217, %c0_218] : memref<8x128xf32, #tpu.memory_space<vmem>>, vector<8x128xf32>
    tpu.vector_store %arg13[%c0_217, %c0_218], %307 {strides = array<i32>} : memref<8x128xf32, #tpu.memory_space<vmem>>, vector<8x128xf32>,
    %c0_219 = arith.constant 0 : index
    %c0_220 = arith.constant 0 : index
    %311 = vector.load %arg12[%c0_219, %c0_220] : memref<8x128xf32, #tpu.memory_space<vmem>>, vector<8x128xf32>
    tpu.vector_store %arg12[%c0_219, %c0_220], %309 {strides = array<i32>} : memref<8x128xf32, #tpu.memory_space<vmem>>, vector<8x128xf32>,
    %c2_i32_221 = arith.constant 2 : i32
    %c8_i32_222 = arith.constant 8 : i32
    %312 = arith.muli %c2_i32_221, %c8_i32_222 : i32
    %313 = tpu.assume_multiple %312, 8 : i32
    %314 = arith.index_cast %313 : i32 to index
    %c0_223 = arith.constant 0 : index
    %315 = vector.load %arg10[%314, %c0_223] : memref<64x128xf32, #tpu.memory_space<vmem>>, vector<8x128xf32>
    %c0_224 = arith.constant 0 : index
    %c0_225 = arith.constant 0 : index
    %316 = vector.load %arg12[%c0_224, %c0_225] : memref<8x128xf32, #tpu.memory_space<vmem>>, vector<8x128xf32>
    %c0_226 = arith.constant 0 : index
    %c0_227 = arith.constant 0 : index
    %317 = vector.load %arg5[%c0_226, %c0_227] : memref<128x128xf32, #tpu.memory_space<vmem>>, vector<128x128xf32>
    %cst_228 = arith.constant dense<0.000000e+00> : vector<8x128xf32>
    %318 = tpu.matmul %316, %317, %cst_228 {dimension_numbers = #tpu.dot_dimension_numbers<[1], [0], [0], [1], [0, 0, 1, 1], [], []>} : vector<8x128xf32>, vector<128x128xf32>, vector<8x128xf32> -> vector<8x128xf32>
    %319 = arith.addf %315, %318 : vector<8x128xf32>
    %320 = arith.negf %319 : vector<8x128xf32>
    %321 = math.exp %320 : vector<8x128xf32>
    %cst_229 = arith.constant 1.000000e+00 : f32
    %322 = vector.broadcast %cst_229 : f32 to vector<8x128xf32>
    %323 = arith.addf %322, %321 : vector<8x128xf32>
    %324 = arith.divf %322, %323 : vector<8x128xf32>
    %325 = math.tanh %319 : vector<8x128xf32>
    %c96_i32_230 = arith.constant 96 : i32
    %326 = tpu.dynamic_rotate %324 by %c96_i32_230 dim 1 : vector<8x128xf32>, i32 -> vector<8x128xf32>
    %c64_i32_231 = arith.constant 64 : i32
    %327 = tpu.dynamic_rotate %325 by %c64_i32_231 dim 1 : vector<8x128xf32>, i32 -> vector<8x128xf32>
    %c32_i32_232 = arith.constant 32 : i32
    %328 = tpu.dynamic_rotate %324 by %c32_i32_232 dim 1 : vector<8x128xf32>, i32 -> vector<8x128xf32>
    %c0_233 = arith.constant 0 : index
    %c0_234 = arith.constant 0 : index
    %329 = vector.load %arg13[%c0_233, %c0_234] : memref<8x128xf32, #tpu.memory_space<vmem>>, vector<8x128xf32>
    %330 = arith.mulf %326, %329 : vector<8x128xf32>
    %331 = arith.mulf %324, %327 : vector<8x128xf32>
    %332 = arith.addf %330, %331 : vector<8x128xf32>
    %333 = math.tanh %332 : vector<8x128xf32>
    %334 = arith.mulf %328, %333 : vector<8x128xf32>
    %c0_235 = arith.constant 0 : index
    %c0_236 = arith.constant 0 : index
    %335 = vector.load %arg13[%c0_235, %c0_236] : memref<8x128xf32, #tpu.memory_space<vmem>>, vector<8x128xf32>
    tpu.vector_store %arg13[%c0_235, %c0_236], %332 {strides = array<i32>} : memref<8x128xf32, #tpu.memory_space<vmem>>, vector<8x128xf32>,
    %c0_237 = arith.constant 0 : index
    %c0_238 = arith.constant 0 : index
    %336 = vector.load %arg12[%c0_237, %c0_238] : memref<8x128xf32, #tpu.memory_space<vmem>>, vector<8x128xf32>
    tpu.vector_store %arg12[%c0_237, %c0_238], %334 {strides = array<i32>} : memref<8x128xf32, #tpu.memory_space<vmem>>, vector<8x128xf32>,
    %c3_i32_239 = arith.constant 3 : i32
    %c8_i32_240 = arith.constant 8 : i32
    %337 = arith.muli %c3_i32_239, %c8_i32_240 : i32
    %338 = tpu.assume_multiple %337, 8 : i32
    %339 = arith.index_cast %338 : i32 to index
    %c0_241 = arith.constant 0 : index
    %340 = vector.load %arg10[%339, %c0_241] : memref<64x128xf32, #tpu.memory_space<vmem>>, vector<8x128xf32>
    %c0_242 = arith.constant 0 : index
    %c0_243 = arith.constant 0 : index
    %341 = vector.load %arg12[%c0_242, %c0_243] : memref<8x128xf32, #tpu.memory_space<vmem>>, vector<8x128xf32>
    %c0_244 = arith.constant 0 : index
    %c0_245 = arith.constant 0 : index
    %342 = vector.load %arg5[%c0_244, %c0_245] : memref<128x128xf32, #tpu.memory_space<vmem>>, vector<128x128xf32>
    %cst_246 = arith.constant dense<0.000000e+00> : vector<8x128xf32>
    %343 = tpu.matmul %341, %342, %cst_246 {dimension_numbers = #tpu.dot_dimension_numbers<[1], [0], [0], [1], [0, 0, 1, 1], [], []>} : vector<8x128xf32>, vector<128x128xf32>, vector<8x128xf32> -> vector<8x128xf32>
    %344 = arith.addf %340, %343 : vector<8x128xf32>
    %345 = arith.negf %344 : vector<8x128xf32>
    %346 = math.exp %345 : vector<8x128xf32>
    %cst_247 = arith.constant 1.000000e+00 : f32
    %347 = vector.broadcast %cst_247 : f32 to vector<8x128xf32>
    %348 = arith.addf %347, %346 : vector<8x128xf32>
    %349 = arith.divf %347, %348 : vector<8x128xf32>
    %350 = math.tanh %344 : vector<8x128xf32>
    %c96_i32_248 = arith.constant 96 : i32
    %351 = tpu.dynamic_rotate %349 by %c96_i32_248 dim 1 : vector<8x128xf32>, i32 -> vector<8x128xf32>
    %c64_i32_249 = arith.constant 64 : i32
    %352 = tpu.dynamic_rotate %350 by %c64_i32_249 dim 1 : vector<8x128xf32>, i32 -> vector<8x128xf32>
    %c32_i32_250 = arith.constant 32 : i32
    %353 = tpu.dynamic_rotate %349 by %c32_i32_250 dim 1 : vector<8x128xf32>, i32 -> vector<8x128xf32>
    %c0_251 = arith.constant 0 : index
    %c0_252 = arith.constant 0 : index
    %354 = vector.load %arg13[%c0_251, %c0_252] : memref<8x128xf32, #tpu.memory_space<vmem>>, vector<8x128xf32>
    %355 = arith.mulf %351, %354 : vector<8x128xf32>
    %356 = arith.mulf %349, %352 : vector<8x128xf32>
    %357 = arith.addf %355, %356 : vector<8x128xf32>
    %358 = math.tanh %357 : vector<8x128xf32>
    %359 = arith.mulf %353, %358 : vector<8x128xf32>
    %c0_253 = arith.constant 0 : index
    %c0_254 = arith.constant 0 : index
    %360 = vector.load %arg13[%c0_253, %c0_254] : memref<8x128xf32, #tpu.memory_space<vmem>>, vector<8x128xf32>
    tpu.vector_store %arg13[%c0_253, %c0_254], %357 {strides = array<i32>} : memref<8x128xf32, #tpu.memory_space<vmem>>, vector<8x128xf32>,
    %c0_255 = arith.constant 0 : index
    %c0_256 = arith.constant 0 : index
    %361 = vector.load %arg12[%c0_255, %c0_256] : memref<8x128xf32, #tpu.memory_space<vmem>>, vector<8x128xf32>
    tpu.vector_store %arg12[%c0_255, %c0_256], %359 {strides = array<i32>} : memref<8x128xf32, #tpu.memory_space<vmem>>, vector<8x128xf32>,
    %c4_i32_257 = arith.constant 4 : i32
    %c8_i32_258 = arith.constant 8 : i32
    %362 = arith.muli %c4_i32_257, %c8_i32_258 : i32
    %363 = tpu.assume_multiple %362, 8 : i32
    %364 = arith.index_cast %363 : i32 to index
    %c0_259 = arith.constant 0 : index
    %365 = vector.load %arg10[%364, %c0_259] : memref<64x128xf32, #tpu.memory_space<vmem>>, vector<8x128xf32>
    %c0_260 = arith.constant 0 : index
    %c0_261 = arith.constant 0 : index
    %366 = vector.load %arg12[%c0_260, %c0_261] : memref<8x128xf32, #tpu.memory_space<vmem>>, vector<8x128xf32>
    %c0_262 = arith.constant 0 : index
    %c0_263 = arith.constant 0 : index
    %367 = vector.load %arg5[%c0_262, %c0_263] : memref<128x128xf32, #tpu.memory_space<vmem>>, vector<128x128xf32>
    %cst_264 = arith.constant dense<0.000000e+00> : vector<8x128xf32>
    %368 = tpu.matmul %366, %367, %cst_264 {dimension_numbers = #tpu.dot_dimension_numbers<[1], [0], [0], [1], [0, 0, 1, 1], [], []>} : vector<8x128xf32>, vector<128x128xf32>, vector<8x128xf32> -> vector<8x128xf32>
    %369 = arith.addf %365, %368 : vector<8x128xf32>
    %370 = arith.negf %369 : vector<8x128xf32>
    %371 = math.exp %370 : vector<8x128xf32>
    %cst_265 = arith.constant 1.000000e+00 : f32
    %372 = vector.broadcast %cst_265 : f32 to vector<8x128xf32>
    %373 = arith.addf %372, %371 : vector<8x128xf32>
    %374 = arith.divf %372, %373 : vector<8x128xf32>
    %375 = math.tanh %369 : vector<8x128xf32>
    %c96_i32_266 = arith.constant 96 : i32
    %376 = tpu.dynamic_rotate %374 by %c96_i32_266 dim 1 : vector<8x128xf32>, i32 -> vector<8x128xf32>
    %c64_i32_267 = arith.constant 64 : i32
    %377 = tpu.dynamic_rotate %375 by %c64_i32_267 dim 1 : vector<8x128xf32>, i32 -> vector<8x128xf32>
    %c32_i32_268 = arith.constant 32 : i32
    %378 = tpu.dynamic_rotate %374 by %c32_i32_268 dim 1 : vector<8x128xf32>, i32 -> vector<8x128xf32>
    %c0_269 = arith.constant 0 : index
    %c0_270 = arith.constant 0 : index
    %379 = vector.load %arg13[%c0_269, %c0_270] : memref<8x128xf32, #tpu.memory_space<vmem>>, vector<8x128xf32>
    %380 = arith.mulf %376, %379 : vector<8x128xf32>
    %381 = arith.mulf %374, %377 : vector<8x128xf32>
    %382 = arith.addf %380, %381 : vector<8x128xf32>
    %383 = math.tanh %382 : vector<8x128xf32>
    %384 = arith.mulf %378, %383 : vector<8x128xf32>
    %c0_271 = arith.constant 0 : index
    %c0_272 = arith.constant 0 : index
    %385 = vector.load %arg13[%c0_271, %c0_272] : memref<8x128xf32, #tpu.memory_space<vmem>>, vector<8x128xf32>
    tpu.vector_store %arg13[%c0_271, %c0_272], %382 {strides = array<i32>} : memref<8x128xf32, #tpu.memory_space<vmem>>, vector<8x128xf32>,
    %c0_273 = arith.constant 0 : index
    %c0_274 = arith.constant 0 : index
    %386 = vector.load %arg12[%c0_273, %c0_274] : memref<8x128xf32, #tpu.memory_space<vmem>>, vector<8x128xf32>
    tpu.vector_store %arg12[%c0_273, %c0_274], %384 {strides = array<i32>} : memref<8x128xf32, #tpu.memory_space<vmem>>, vector<8x128xf32>,
    %c5_i32_275 = arith.constant 5 : i32
    %c8_i32_276 = arith.constant 8 : i32
    %387 = arith.muli %c5_i32_275, %c8_i32_276 : i32
    %388 = tpu.assume_multiple %387, 8 : i32
    %389 = arith.index_cast %388 : i32 to index
    %c0_277 = arith.constant 0 : index
    %390 = vector.load %arg10[%389, %c0_277] : memref<64x128xf32, #tpu.memory_space<vmem>>, vector<8x128xf32>
    %c0_278 = arith.constant 0 : index
    %c0_279 = arith.constant 0 : index
    %391 = vector.load %arg12[%c0_278, %c0_279] : memref<8x128xf32, #tpu.memory_space<vmem>>, vector<8x128xf32>
    %c0_280 = arith.constant 0 : index
    %c0_281 = arith.constant 0 : index
    %392 = vector.load %arg5[%c0_280, %c0_281] : memref<128x128xf32, #tpu.memory_space<vmem>>, vector<128x128xf32>
    %cst_282 = arith.constant dense<0.000000e+00> : vector<8x128xf32>
    %393 = tpu.matmul %391, %392, %cst_282 {dimension_numbers = #tpu.dot_dimension_numbers<[1], [0], [0], [1], [0, 0, 1, 1], [], []>} : vector<8x128xf32>, vector<128x128xf32>, vector<8x128xf32> -> vector<8x128xf32>
    %394 = arith.addf %390, %393 : vector<8x128xf32>
    %395 = arith.negf %394 : vector<8x128xf32>
    %396 = math.exp %395 : vector<8x128xf32>
    %cst_283 = arith.constant 1.000000e+00 : f32
    %397 = vector.broadcast %cst_283 : f32 to vector<8x128xf32>
    %398 = arith.addf %397, %396 : vector<8x128xf32>
    %399 = arith.divf %397, %398 : vector<8x128xf32>
    %400 = math.tanh %394 : vector<8x128xf32>
    %c96_i32_284 = arith.constant 96 : i32
    %401 = tpu.dynamic_rotate %399 by %c96_i32_284 dim 1 : vector<8x128xf32>, i32 -> vector<8x128xf32>
    %c64_i32_285 = arith.constant 64 : i32
    %402 = tpu.dynamic_rotate %400 by %c64_i32_285 dim 1 : vector<8x128xf32>, i32 -> vector<8x128xf32>
    %c32_i32_286 = arith.constant 32 : i32
    %403 = tpu.dynamic_rotate %399 by %c32_i32_286 dim 1 : vector<8x128xf32>, i32 -> vector<8x128xf32>
    %c0_287 = arith.constant 0 : index
    %c0_288 = arith.constant 0 : index
    %404 = vector.load %arg13[%c0_287, %c0_288] : memref<8x128xf32, #tpu.memory_space<vmem>>, vector<8x128xf32>
    %405 = arith.mulf %401, %404 : vector<8x128xf32>
    %406 = arith.mulf %399, %402 : vector<8x128xf32>
    %407 = arith.addf %405, %406 : vector<8x128xf32>
    %408 = math.tanh %407 : vector<8x128xf32>
    %409 = arith.mulf %403, %408 : vector<8x128xf32>
    %c0_289 = arith.constant 0 : index
    %c0_290 = arith.constant 0 : index
    %410 = vector.load %arg13[%c0_289, %c0_290] : memref<8x128xf32, #tpu.memory_space<vmem>>, vector<8x128xf32>
    tpu.vector_store %arg13[%c0_289, %c0_290], %407 {strides = array<i32>} : memref<8x128xf32, #tpu.memory_space<vmem>>, vector<8x128xf32>,
    %c0_291 = arith.constant 0 : index
    %c0_292 = arith.constant 0 : index
    %411 = vector.load %arg12[%c0_291, %c0_292] : memref<8x128xf32, #tpu.memory_space<vmem>>, vector<8x128xf32>
    tpu.vector_store %arg12[%c0_291, %c0_292], %409 {strides = array<i32>} : memref<8x128xf32, #tpu.memory_space<vmem>>, vector<8x128xf32>,
    %c6_i32_293 = arith.constant 6 : i32
    %c8_i32_294 = arith.constant 8 : i32
    %412 = arith.muli %c6_i32_293, %c8_i32_294 : i32
    %413 = tpu.assume_multiple %412, 8 : i32
    %414 = arith.index_cast %413 : i32 to index
    %c0_295 = arith.constant 0 : index
    %415 = vector.load %arg10[%414, %c0_295] : memref<64x128xf32, #tpu.memory_space<vmem>>, vector<8x128xf32>
    %c0_296 = arith.constant 0 : index
    %c0_297 = arith.constant 0 : index
    %416 = vector.load %arg12[%c0_296, %c0_297] : memref<8x128xf32, #tpu.memory_space<vmem>>, vector<8x128xf32>
    %c0_298 = arith.constant 0 : index
    %c0_299 = arith.constant 0 : index
    %417 = vector.load %arg5[%c0_298, %c0_299] : memref<128x128xf32, #tpu.memory_space<vmem>>, vector<128x128xf32>
    %cst_300 = arith.constant dense<0.000000e+00> : vector<8x128xf32>
    %418 = tpu.matmul %416, %417, %cst_300 {dimension_numbers = #tpu.dot_dimension_numbers<[1], [0], [0], [1], [0, 0, 1, 1], [], []>} : vector<8x128xf32>, vector<128x128xf32>, vector<8x128xf32> -> vector<8x128xf32>
    %419 = arith.addf %415, %418 : vector<8x128xf32>
    %420 = arith.negf %419 : vector<8x128xf32>
    %421 = math.exp %420 : vector<8x128xf32>
    %cst_301 = arith.constant 1.000000e+00 : f32
    %422 = vector.broadcast %cst_301 : f32 to vector<8x128xf32>
    %423 = arith.addf %422, %421 : vector<8x128xf32>
    %424 = arith.divf %422, %423 : vector<8x128xf32>
    %425 = math.tanh %419 : vector<8x128xf32>
    %c96_i32_302 = arith.constant 96 : i32
    %426 = tpu.dynamic_rotate %424 by %c96_i32_302 dim 1 : vector<8x128xf32>, i32 -> vector<8x128xf32>
    %c64_i32_303 = arith.constant 64 : i32
    %427 = tpu.dynamic_rotate %425 by %c64_i32_303 dim 1 : vector<8x128xf32>, i32 -> vector<8x128xf32>
    %c32_i32_304 = arith.constant 32 : i32
    %428 = tpu.dynamic_rotate %424 by %c32_i32_304 dim 1 : vector<8x128xf32>, i32 -> vector<8x128xf32>
    %c0_305 = arith.constant 0 : index
    %c0_306 = arith.constant 0 : index
    %429 = vector.load %arg13[%c0_305, %c0_306] : memref<8x128xf32, #tpu.memory_space<vmem>>, vector<8x128xf32>
    %430 = arith.mulf %426, %429 : vector<8x128xf32>
    %431 = arith.mulf %424, %427 : vector<8x128xf32>
    %432 = arith.addf %430, %431 : vector<8x128xf32>
    %433 = math.tanh %432 : vector<8x128xf32>
    %434 = arith.mulf %428, %433 : vector<8x128xf32>
    %c0_307 = arith.constant 0 : index
    %c0_308 = arith.constant 0 : index
    %435 = vector.load %arg13[%c0_307, %c0_308] : memref<8x128xf32, #tpu.memory_space<vmem>>, vector<8x128xf32>
    tpu.vector_store %arg13[%c0_307, %c0_308], %432 {strides = array<i32>} : memref<8x128xf32, #tpu.memory_space<vmem>>, vector<8x128xf32>,
    %c0_309 = arith.constant 0 : index
    %c0_310 = arith.constant 0 : index
    %436 = vector.load %arg12[%c0_309, %c0_310] : memref<8x128xf32, #tpu.memory_space<vmem>>, vector<8x128xf32>
    tpu.vector_store %arg12[%c0_309, %c0_310], %434 {strides = array<i32>} : memref<8x128xf32, #tpu.memory_space<vmem>>, vector<8x128xf32>,
    %c7_i32_311 = arith.constant 7 : i32
    %c8_i32_312 = arith.constant 8 : i32
    %437 = arith.muli %c7_i32_311, %c8_i32_312 : i32
    %438 = tpu.assume_multiple %437, 8 : i32
    %439 = arith.index_cast %438 : i32 to index
    %c0_313 = arith.constant 0 : index
    %440 = vector.load %arg10[%439, %c0_313] : memref<64x128xf32, #tpu.memory_space<vmem>>, vector<8x128xf32>
    %c0_314 = arith.constant 0 : index
    %c0_315 = arith.constant 0 : index
    %441 = vector.load %arg12[%c0_314, %c0_315] : memref<8x128xf32, #tpu.memory_space<vmem>>, vector<8x128xf32>
    %c0_316 = arith.constant 0 : index
    %c0_317 = arith.constant 0 : index
    %442 = vector.load %arg5[%c0_316, %c0_317] : memref<128x128xf32, #tpu.memory_space<vmem>>, vector<128x128xf32>
    %cst_318 = arith.constant dense<0.000000e+00> : vector<8x128xf32>
    %443 = tpu.matmul %441, %442, %cst_318 {dimension_numbers = #tpu.dot_dimension_numbers<[1], [0], [0], [1], [0, 0, 1, 1], [], []>} : vector<8x128xf32>, vector<128x128xf32>, vector<8x128xf32> -> vector<8x128xf32>
    %444 = arith.addf %440, %443 : vector<8x128xf32>
    %445 = arith.negf %444 : vector<8x128xf32>
    %446 = math.exp %445 : vector<8x128xf32>
    %cst_319 = arith.constant 1.000000e+00 : f32
    %447 = vector.broadcast %cst_319 : f32 to vector<8x128xf32>
    %448 = arith.addf %447, %446 : vector<8x128xf32>
    %449 = arith.divf %447, %448 : vector<8x128xf32>
    %450 = math.tanh %444 : vector<8x128xf32>
    %c96_i32_320 = arith.constant 96 : i32
    %451 = tpu.dynamic_rotate %449 by %c96_i32_320 dim 1 : vector<8x128xf32>, i32 -> vector<8x128xf32>
    %c64_i32_321 = arith.constant 64 : i32
    %452 = tpu.dynamic_rotate %450 by %c64_i32_321 dim 1 : vector<8x128xf32>, i32 -> vector<8x128xf32>
    %c32_i32_322 = arith.constant 32 : i32
    %453 = tpu.dynamic_rotate %449 by %c32_i32_322 dim 1 : vector<8x128xf32>, i32 -> vector<8x128xf32>
    %c0_323 = arith.constant 0 : index
    %c0_324 = arith.constant 0 : index
    %454 = vector.load %arg13[%c0_323, %c0_324] : memref<8x128xf32, #tpu.memory_space<vmem>>, vector<8x128xf32>
    %455 = arith.mulf %451, %454 : vector<8x128xf32>
    %456 = arith.mulf %449, %452 : vector<8x128xf32>
    %457 = arith.addf %455, %456 : vector<8x128xf32>
    %458 = math.tanh %457 : vector<8x128xf32>
    %459 = arith.mulf %453, %458 : vector<8x128xf32>
    %c0_325 = arith.constant 0 : index
    %c0_326 = arith.constant 0 : index
    %460 = vector.load %arg13[%c0_325, %c0_326] : memref<8x128xf32, #tpu.memory_space<vmem>>, vector<8x128xf32>
    tpu.vector_store %arg13[%c0_325, %c0_326], %457 {strides = array<i32>} : memref<8x128xf32, #tpu.memory_space<vmem>>, vector<8x128xf32>,
    %c0_327 = arith.constant 0 : index
    %c0_328 = arith.constant 0 : index
    %461 = vector.load %arg12[%c0_327, %c0_328] : memref<8x128xf32, #tpu.memory_space<vmem>>, vector<8x128xf32>
    tpu.vector_store %arg12[%c0_327, %c0_328], %459 {strides = array<i32>} : memref<8x128xf32, #tpu.memory_space<vmem>>, vector<8x128xf32>,
    %c8_i32_329 = arith.constant 8 : i32
    %c0_330 = arith.constant 0 : index
    %c0_331 = arith.constant 0 : index
    %462 = vector.load %arg12[%c0_330, %c0_331] : memref<8x128xf32, #tpu.memory_space<vmem>>, vector<8x128xf32>
    %c0_332 = arith.constant 0 : index
    %c0_333 = arith.constant 0 : index
    %463 = vector.load %arg7[%c0_332, %c0_333] : memref<128x128xf32, #tpu.memory_space<vmem>>, vector<128x128xf32>
    %cst_334 = arith.constant dense<0.000000e+00> : vector<8x128xf32>
    %464 = tpu.matmul %462, %463, %cst_334 {dimension_numbers = #tpu.dot_dimension_numbers<[1], [0], [0], [1], [0, 0, 1, 1], [], []>} : vector<8x128xf32>, vector<128x128xf32>, vector<8x128xf32> -> vector<8x128xf32>
    %c0_335 = arith.constant 0 : index
    %c0_336 = arith.constant 0 : index
    %465 = vector.load %arg8[%c0_335, %c0_336] : memref<1x128xf32, #tpu.memory_space<vmem>>, vector<1x128xf32>
    %466 = vector.broadcast %465 : vector<1x128xf32> to vector<8x128xf32>
    %467 = arith.addf %464, %466 : vector<8x128xf32>
    %c0_337 = arith.constant 0 : index
    %c0_338 = arith.constant 0 : index
    %468 = vector.load %arg9[%c0_337, %c0_338] : memref<8x128xf32, #tpu.memory_space<vmem>>, vector<8x128xf32>
    tpu.vector_store %arg9[%c0_337, %c0_338], %467 {strides = array<i32>} : memref<8x128xf32, #tpu.memory_space<vmem>>, vector<8x128xf32>,
    return
  }
}

</mosaic_0001>

<bundles_post_ra>
// kernel: lstm_model_forward.1
= control target key start
LH: loop header
LB: loop body
LE: loop exit
PB: predicated region body
PF: predicated region fallthrough
CT: control target
= control target key end

     0   :  { %14 = vsyncpa [#allocation7], 0  ;;  %s4588_s0 = inlined_call_operand.vmem [shape: f32[64,4], index: 0, kind: input, shape index: {}]   ;;  %s4589_s1 = inlined_call_operand.vmem [shape: f32[4,128], index: 1, kind: input, shape index: {}]   ;;  %s4590_s2 = inlined_call_operand.hbm [shape: f32[128,128], index: 2, kind: input, shape index: {}]   ;;  %s4591_s3 = inlined_call_operand.vmem [shape: f32[1,128], index: 3, kind: input, shape index: {}]   ;;  %s4592_s4 = inlined_call_operand.hbm [shape: f32[128,128], index: 4, kind: input, shape index: {}]   ;;  %s4593_s5 = inlined_call_operand.hbm [shape: f32[128,128], index: 5, kind: input, shape index: {}]   ;;  %s4594_s6 = inlined_call_operand.vmem [shape: f32[1,128], index: 6, kind: input, shape index: {}]   ;;  %s4595_s7 = inlined_call_operand.vmem [shape: f32[128,128], index: 7, kind: input, shape index: {}]   ;;  %s4596_s8 = inlined_call_operand.vmem [shape: f32[1,128], index: 8, kind: input, shape index: {}]   ;;  %s4597_s9 = inlined_call_operand.vmem [shape: f32[8,128], index: 9, kind: output, shape index: {}]  }
   0x1   :  { %15 = vsyncpa [#allocation9], 0  ;;  %s3914_s30 = smov [#allocation8]   ;;  %s3915_s11 = smov [#allocation6]  }
   0x2   :  { %s39_s10 = sshll.u32 %s3914_s30, 4  ;;  %s25_s12 = sshll.u32 %s3915_s11, 4  ;;  %s40_s10 = int_to_ptr.vmem [resolvable:$true] %s39_s10  ;;  %s3975_s12 = int_to_ptr.vmem [resolvable:$true] %s25_s12 }
   0x3   :  { %s3844_s15 = scalar_lea.hbm %s4592_s4, 2048 }
   0x4   :  { %p3845_p0 = scmp.ne.s32.totalorder %s4592_s4, %s3844_s15  ;;  %p3848_p1 = scmp.lt.u32.totalorder %s3844_s15, %s4592_s4 }
   0x6   :  { %p3850_p2 = pnand %p3848_p1, %p3845_p0 }
   0x8   :  { %3853 = shalt.err (!%p3850_p2)
}
   0x9   :  { %s3854_s20 = scalar_lea.vmem %s40_s10, 2048  ;;  %p3859_p4 = scmp.lt.s32.totalorder %s40_s10, %s40_s10 }
   0xa   :  { %p3855_p3 = scmp.ne.s32.totalorder %s40_s10, %s3854_s20  ;;  %p3860_p5 = scmp.lt.s32.totalorder %s3854_s20, %s3854_s20 }
   0xc   :  { %p3861_p6 = por %p3860_p5, %p3859_p4 }
   0xe   :  { %p3862_p7 = pnand %p3861_p6, %p3855_p3 }
  0x10   :  { %3865 = shalt.err (!%p3862_p7)
}
  0x11   :  { %s3916_s21 = smov 128   ;;  %s3917_s22 = smov 8  }
  0x12   :  { %45 = dma.hbm_to_vmem [thread:$0]  %s4592_s4, 2048, %s40_s10, [#allocation9], %s3916_s21, %s3916_s21, %s3917_s22  }
  0x13   :  { %s3866_s27 = scalar_lea.hbm %s4590_s2, 2048 }
  0x14   :  { %p3867_p8 = scmp.ne.s32.totalorder %s4590_s2, %s3866_s27  ;;  %p3870_p9 = scmp.lt.u32.totalorder %s3866_s27, %s4590_s2 }
  0x16   :  { %p3872_p10 = pnand %p3870_p9, %p3867_p8 }
  0x18   :  { %3875 = shalt.err (!%p3872_p10)
}
  0x19   :  { %s3876_s13 = scalar_lea.vmem %s3975_s12, 2048  ;;  %p3881_p12 = scmp.lt.s32.totalorder %s3975_s12, %s3975_s12 }
  0x1a   :  { %p3877_p11 = scmp.ne.s32.totalorder %s3975_s12, %s3876_s13  ;;  %p3882_p13 = scmp.lt.s32.totalorder %s3876_s13, %s3876_s13 }
  0x1c   :  { %p3883_p0 = por %p3882_p13, %p3881_p12 }
  0x1e   :  { %p3884_p1 = pnand %p3883_p0, %p3877_p11 }
  0x20   :  { %3887 = shalt.err (!%p3884_p1)
}
  0x21   :  { %31 = dma.hbm_to_vmem [thread:$0]  %s4590_s2, 2048, %s3975_s12, [#allocation7], %s3916_s21, %s3916_s21, %s3917_s22  }
  0x22   :  { %s3918_s14 = smov [#allocation10]   ;;  %s3888_s18 = scalar_lea.hbm %s4593_s5, 2048 }
  0x23   :  { %s51_s15 = sshll.u32 %s3918_s14, 4  ;;  %p3889_p2 = scmp.ne.s32.totalorder %s4593_s5, %s3888_s18  ;;  %s52_s15 = int_to_ptr.vmem [resolvable:$true] %s51_s15 }
  0x24   :  { %p3892_p3 = scmp.lt.u32.totalorder %s3888_s18, %s4593_s5 }
  0x26   :  { %p3894_p4 = pnand %p3892_p3, %p3889_p2 }
  0x28   :  { %3897 = shalt.err (!%p3894_p4)
}
  0x29   :  { %s3898_s25 = scalar_lea.vmem %s52_s15, 2048  ;;  %p3903_p6 = scmp.lt.s32.totalorder %s52_s15, %s52_s15 }
  0x2a   :  { %p3899_p5 = scmp.ne.s32.totalorder %s52_s15, %s3898_s25  ;;  %p3904_p7 = scmp.lt.s32.totalorder %s3898_s25, %s3898_s25 }
  0x2c   :  { %p3905_p8 = por %p3904_p7, %p3903_p6 }
  0x2e   :  { %p3906_p9 = pnand %p3905_p8, %p3899_p5 }
  0x30   :  { %3909 = shalt.err (!%p3906_p9)
}
  0x31   :  { %57 = dma.hbm_to_vmem [thread:$0]  %s4593_s5, 2048, %s52_s15, [#allocation9], %s3916_s21, %s3916_s21, %s3917_s22  }
  0x32   :  { %3910 = dma.done.wait [#allocation7], 2048  }
  0x33   :  { %3911 = vsyncadd [#allocation7], 4294965248 }
  0x34   :  { %3912 = dma.done.wait [#allocation9], 4096  }
  0x35   :  { %3913 = vsyncadd [#allocation9], 4294963200  ;;  %v3919_v0 = vmov 0.0|0.0   ;;  %vm3920_vm0 = vmmov 0   ;;  %v3921_v1 = vmov 0.0   ;;  %v235_v2 = vld [vmem:[#allocation6] sm:$0xff] }
  0x36   :  { %3265 = vmatprep.subr.bf16.mxu1 %v3919_v0  ;;  %2658 = vmatprep.mubr.msk.f32.mxu1 %vm3920_vm0, %v3921_v1  ;;  %v236_v3 = vld [vmem:[#allocation6 + $0x8] sm:$0xff]  ;;  %v237_v4 = vld [vmem:[#allocation6 + $0x10] sm:$0xff]  ;;  %v238_v6 = vld [vmem:[#allocation6 + $0x18] sm:$0xff]  ;;  %vm116_vm1 = vcmask 1043456   ;;  %vm91_vm2 = vcmask 31744   ;;  %s3922_s18 = smov 32  }
  0x37   :  { %v4030_v5 = vpack.c.bf16 %v236_v3, %v235_v2  ;;  %v4033_v7 = vpack.c.bf16 %v238_v6, %v237_v4  ;;  %v239_v8 = vld [vmem:[#allocation6 + $0x20] sm:$0xff]  ;;  %v240_v9 = vld [vmem:[#allocation6 + $0x28] sm:$0xff]  ;;  %v241_v14 = vld [vmem:[#allocation6 + $0x30] sm:$0xff]  ;;  %s3923_s19 = smov 96   ;;  %s3924_s24 = smov 64  }
  0x38   :  { %v83_v10 = vld [vmem:[%s4589_s1] sm:$0xf]  ;;  %v76_v12 = vld [vmem:[%s4588_s0 + $0x8] sm:$0xff]  ;;  %v4047_v13 = vpack.c.bf16 %v240_v9, %v239_v8  ;;  %v242_v15 = vld [vmem:[#allocation6 + $0x38] sm:$0xff] }
  0x39   :  { %3267 = vmatpush3.bf16.msra.mxu1 %v4030_v5  ;;  %2612 = vmatprep.subr.msk.mxu0 %vm116_vm1, %v83_v10  ;;  %v75_v11 = vld [vmem:[%s4588_s0] sm:$0xff]  ;;  %v4055_v16 = vpack.c.bf16 %v242_v15, %v241_v14  ;;  %v244_v18 = vld [vmem:[#allocation6 + $0x48] sm:$0xff]  ;;  %v245_v20 = vld [vmem:[#allocation6 + $0x50] sm:$0xff] }
  0x3a   :  { %3268 = vmatprep.subr.bf16.mxu1 %v3919_v0  ;;  %2613 = vmatpush3.msk.msra.mxu0 %vm116_vm1, %v83_v10  ;;  %v243_v17 = vld [vmem:[#allocation6 + $0x40] sm:$0xff]  ;;  %v246_v21 = vld [vmem:[#allocation6 + $0x58] sm:$0xff]  ;;  %v248_v24 = vld [vmem:[#allocation6 + $0x68] sm:$0xff] }
  0x3b   :  { %2614 = vmatprep.mubr.msk.f32.mxu0 %vm91_vm2, %v75_v11  ;;  %3289 = vmatprep.subr.bf16.mxu0 %v3919_v0  ;;  %v4061_v19 = vpack.c.bf16 %v244_v18, %v243_v17  ;;  %v4067_v22 = vpack.c.bf16 %v246_v21, %v245_v20  ;;  %v247_v23 = vld [vmem:[#allocation6 + $0x60] sm:$0xff]  ;;  %v249_v26 = vld [vmem:[#allocation6 + $0x70] sm:$0xff]  ;;  %v250_v27 = vld [vmem:[#allocation6 + $0x78] sm:$0xff] }
  0x3c   :  { %2615 = vmatmul.mubr.msk.f32.vlgmr.msra.gmra.mrb[0].mxu0 %vm91_vm2, %v76_v12  ;;  %v4073_v25 = vpack.c.bf16 %v248_v24, %v247_v23  ;;  %v4079_v28 = vpack.c.bf16 %v250_v27, %v249_v26  ;;  %v4114_v31 = vld [vmem:[%s4591_s3] ss:$0 sm:$0xff]  ;;  %v77_v39 = vld [vmem:[%s4588_s0 + $0x10] sm:$0xff]  ;;  %v78_v40 = vld [vmem:[%s4588_s0 + $0x18] sm:$0xff] }
  0x3d   :  { %3270 = vmatpush3.bf16.msra.mxu1 %v4033_v7  ;;  %3291 = vmatpush3.bf16.msra.mxu0 %v4030_v5  ;;  %v79_v41 = vld [vmem:[%s4588_s0 + $0x20] sm:$0xff]  ;;  %v80_v42 = vld [vmem:[%s4588_s0 + $0x28] sm:$0xff]  ;;  %v81_v43 = vld [vmem:[%s4588_s0 + $0x30] sm:$0xff] }
  0x3e   :  { %3271 = vmatprep.subr.bf16.mxu1 %v3919_v0  ;;  %3292 = vmatprep.subr.bf16.mxu0 %v3919_v0  ;;  %v82_v45 = vld [vmem:[%s4588_s0 + $0x38] sm:$0xff] }
  0x3f   :  { %2617 = vmatprep.mubr.msk.f32.mxu0 %vm91_vm2, %v77_v39 }
  0x40   :  { %2618 = vmatmul.mubr.msk.f32.gmra.mrb[2].mxu0 %vm91_vm2, %v78_v40 }
  0x41   :  { %3273 = vmatpush3.bf16.msra.mxu1 %v4047_v13  ;;  %3294 = vmatpush3.bf16.msra.mxu0 %v4033_v7 }
  0x42   :  { %3274 = vmatprep.subr.bf16.mxu1 %v3919_v0  ;;  %3295 = vmatprep.subr.bf16.mxu0 %v3919_v0 }
  0x43   :  { %2620 = vmatprep.mubr.msk.f32.mxu0 %vm91_vm2, %v79_v41 }
  0x44   :  { %2621 = vmatmul.mubr.msk.f32.gmra.mrb[4].mxu0 %vm91_vm2, %v80_v42 }
  0x45   :  { %3276 = vmatpush3.bf16.msra.mxu1 %v4055_v16  ;;  %3297 = vmatpush3.bf16.msra.mxu0 %v4047_v13 }
  0x46   :  { %3277 = vmatprep.subr.bf16.mxu1 %v3919_v0  ;;  %3298 = vmatprep.subr.bf16.mxu0 %v3919_v0 }
  0x47   :  { %2623 = vmatprep.mubr.msk.f32.mxu0 %vm91_vm2, %v81_v43 }
  0x48   :  { %2624 = vmatmul.mubr.msk.f32.gmra.mrb[6].mxu0 %vm91_vm2, %v82_v45 }
  0x49   :  { %3279 = vmatpush3.bf16.msra.mxu1 %v4061_v19  ;;  %3300 = vmatpush3.bf16.msra.mxu0 %v4055_v16 }
  0x4a   :  { %3280 = vmatprep.subr.bf16.mxu1 %v3919_v0  ;;  %3301 = vmatprep.subr.bf16.mxu0 %v3919_v0 }
  0x4b   :  { %2693 = vmatprep.mubr.msk.f32.mxu0 %vm3920_vm0, %v3921_v1 }
  0x4d   :  { %3282 = vmatpush3.bf16.msra.mxu1 %v4067_v22  ;;  %3303 = vmatpush3.bf16.msra.mxu0 %v4061_v19 }
  0x4e   :  { %3283 = vmatprep.subr.bf16.mxu1 %v3919_v0  ;;  %3304 = vmatprep.subr.bf16.mxu0 %v3919_v0 }
  0x51   :  { %3285 = vmatpush3.bf16.msra.mxu1 %v4073_v25  ;;  %3306 = vmatpush3.bf16.msra.mxu0 %v4067_v22 }
  0x52   :  { %3286 = vmatprep.subr.bf16.mxu1 %v3919_v0  ;;  %3307 = vmatprep.subr.bf16.mxu0 %v3919_v0 }
  0x55   :  { %3288 = vmatpush3.bf16.msra.mxu1 %v4079_v28  ;;  %3309 = vmatpush3.bf16.msra.mxu0 %v4073_v25 }
  0x56   :  { %3313 = vmatprep.subr.bf16.mxu1 %v3919_v0  ;;  %3310 = vmatprep.subr.bf16.mxu0 %v3919_v0 }
  0x58   :  { %2659 = vmatmul.mubr.f32.vlgmr.msra.gmra.mrb[0].mxu1 %v3921_v1 }
  0x59   :  { %3315 = vmatpush3.bf16.msra.mxu1 %v4030_v5  ;;  %2728 = vmatprep.mubr.msk.f32.mxu1 %vm3920_vm0, %v3921_v1 }
  0x5a   :  { %3316 = vmatprep.subr.bf16.mxu1 %v3919_v0  ;;  %3312 = vmatpush3.bf16.msra.mxu0 %v4079_v28 }
  0x5b   :  { %3337 = vmatprep.subr.bf16.mxu0 %v3919_v0 }
  0x5d   :  { %3318 = vmatpush3.bf16.msra.mxu1 %v4033_v7 }
  0x5e   :  { %3319 = vmatprep.subr.bf16.mxu1 %v3919_v0 }
  0x61   :  { %3321 = vmatpush3.bf16.msra.mxu1 %v4047_v13 }
  0x62   :  { %3322 = vmatprep.subr.bf16.mxu1 %v3919_v0 }
  0x65   :  { %3324 = vmatpush3.bf16.msra.mxu1 %v4055_v16 }
  0x66   :  { %3325 = vmatprep.subr.bf16.mxu1 %v3919_v0 }
  0x69   :  { %3327 = vmatpush3.bf16.msra.mxu1 %v4061_v19 }
  0x6a   :  { %3328 = vmatprep.subr.bf16.mxu1 %v3919_v0 }
  0x6d   :  { %3330 = vmatpush3.bf16.msra.mxu1 %v4067_v22 }
  0x6e   :  { %3331 = vmatprep.subr.bf16.mxu1 %v3919_v0 }
  0x71   :  { %3333 = vmatpush3.bf16.msra.mxu1 %v4073_v25 }
  0x72   :  { %3334 = vmatprep.subr.bf16.mxu1 %v3919_v0 }
  0x75   :  { %3336 = vmatpush3.bf16.msra.mxu1 %v4079_v28 }
  0x76   :  { %3361 = vmatprep.subr.bf16.mxu1 %v3919_v0 }
 0x10f   :  { %v4109_v29 = vpop.f32.mrb[0].mxu0 }
 0x110   :  { %v186_v30 = vpop.f32.mrb[1].mxu0  ;;  %v192_v61 = vadd.f32 %v4109_v29, %v4114_v31 }
 0x111   :  { %v187_v32 = vadd.f32 %v4114_v31, %v186_v30 }
 0x113   :  { %v4167_v55 = vpop.f32.mrb[2].mxu0 }
 0x114   :  { %v196_v56 = vpop.f32.mrb[3].mxu0  ;;  %v202_v42 = vadd.f32 %v4167_v55, %v4114_v31 }
 0x115   :  { %v197_v21 = vadd.f32 %v4114_v31, %v196_v56 }
 0x117   :  { %v4169_v57 = vpop.f32.mrb[4].mxu0 }
 0x118   :  { %v4171_v58 = vpop.f32.mrb[5].mxu0 }
 0x11b   :  { %v4173_v59 = vpop.f32.mrb[6].mxu0 }
 0x11c   :  { %v4175_v60 = vpop.f32.mrb[7].mxu0 }
 0x12b   :  { %v317_v33 = vpop.f32.mrb[0].mxu1 }
 0x12c   :  { %v321_v34 = vadd.f32 %v317_v33, %v187_v32  ;;  %v2660_v35 = vpop.f32.mrb[1].mxu1 }
 0x12e   :  { %v2272_v36 = vmul.f32 -1.442695, %v321_v34 }
 0x130   :  { %3716 = vpow2.f32 %v2272_v36 }
 0x13a   :  { %v3717_v37 = vpop.eup %3716 }
 0x13b   :  { %v325_v38 = vadd.f32 1.0, %v3717_v37 }
 0x13d   :  { %3718 = vrcp.f32 %v325_v38 }
 0x13e   :  { %3720 = vtanh.f32 %v321_v34 }
 0x147   :  { %v3719_v44 = vpop.eup %3718 }
 0x148   :  { %333 = vrot.lane.b32.xlu1 %v3719_v44, %s3922_s18  ;;  %329 = vrot.lane.b32.xlu0 %v3719_v44, %s3923_s19  ;;  %v3721_v46 = vpop.eup %3720 }
 0x14c   :  { %331 = vrot.lane.b32.xlu0 %v3721_v46, %s3924_s24 }
 0x1ba   :  { %v330_v47 = vpop.permute.xlu0 %329  ;;  %v334_v53 = vpop.permute.xlu1 %333 }
 0x1bb   :  { %v336_v49 = vmul.f32 0.0, %v330_v47 }
 0x1be   :  { %v332_v48 = vpop.permute.xlu0 %331 }
 0x1bf   :  { %v337_v50 = vmul.f32 %v3719_v44, %v332_v48 }
 0x1c1   :  { %v338_v51 = vadd.f32 %v337_v50, %v336_v49 }
 0x1c3   :  { %3722 = vtanh.f32 %v338_v51 }
 0x1cd   :  { %v3723_v52 = vpop.eup %3722 }
 0x1ce   :  { %v4146_v54 = vmul.f32 %v3723_v52, %v334_v53 }
 0x1d0   :  { %2694 = vmatmul.mubr.f32.vlgmr.msra.gmra.mrb[8].mxu0 %v4146_v54 }
 0x1d1   :  { %3339 = vmatpush3.bf16.msra.mxu0 %v4030_v5  ;;  %2763 = vmatprep.mubr.msk.f32.mxu0 %vm3920_vm0, %v3921_v1 }
 0x1d2   :  { %3340 = vmatprep.subr.bf16.mxu0 %v3919_v0 }
 0x1d5   :  { %3342 = vmatpush3.bf16.msra.mxu0 %v4033_v7 }
 0x1d6   :  { %3343 = vmatprep.subr.bf16.mxu0 %v3919_v0 }
 0x1d9   :  { %3345 = vmatpush3.bf16.msra.mxu0 %v4047_v13 }
 0x1da   :  { %3346 = vmatprep.subr.bf16.mxu0 %v3919_v0 }
 0x1dd   :  { %3348 = vmatpush3.bf16.msra.mxu0 %v4055_v16 }
 0x1de   :  { %3349 = vmatprep.subr.bf16.mxu0 %v3919_v0 }
 0x1e1   :  { %3351 = vmatpush3.bf16.msra.mxu0 %v4061_v19 }
 0x1e2   :  { %3352 = vmatprep.subr.bf16.mxu0 %v3919_v0 }
 0x1e5   :  { %3354 = vmatpush3.bf16.msra.mxu0 %v4067_v22 }
 0x1e6   :  { %3355 = vmatprep.subr.bf16.mxu0 %v3919_v0 }
 0x1e9   :  { %3357 = vmatpush3.bf16.msra.mxu0 %v4073_v25 }
 0x1ea   :  { %3358 = vmatprep.subr.bf16.mxu0 %v3919_v0 }
 0x1ed   :  { %3360 = vmatpush3.bf16.msra.mxu0 %v4079_v28 }
 0x1ee   :  { %3385 = vmatprep.subr.bf16.mxu0 %v3919_v0 }
 0x2a3   :  { %v429_v62 = vpop.f32.mrb[8].mxu0 }
 0x2a4   :  { %v433_v63 = vadd.f32 %v429_v62, %v192_v61  ;;  %v2695_v2 = vpop.f32.mrb[9].mxu0 }
 0x2a6   :  { %v2273_v3 = vmul.f32 -1.442695, %v433_v63  ;;  %3724 = vtanh.f32 %v433_v63 }
 0x2a8   :  { %3726 = vpow2.f32 %v2273_v3 }
 0x2b0   :  { %v3725_v4 = vpop.eup %3724 }
 0x2b1   :  { %443 = vrot.lane.b32.xlu0 %v3725_v4, %s3924_s24 }
 0x2b2   :  { %v3727_v6 = vpop.eup %3726 }
 0x2b3   :  { %v437_v8 = vadd.f32 1.0, %v3727_v6 }
 0x2b5   :  { %3728 = vrcp.f32 %v437_v8 }
 0x2bf   :  { %v3729_v9 = vpop.eup %3728 }
 0x2c0   :  { %441 = vrot.lane.b32.xlu1 %v3729_v9, %s3923_s19 }
 0x2c4   :  { %445 = vrot.lane.b32.xlu1 %v3729_v9, %s3922_s18 }
 0x323   :  { %v444_v10 = vpop.permute.xlu0 %443 }
 0x324   :  { %v449_v12 = vmul.f32 %v3729_v9, %v444_v10 }
 0x332   :  { %v442_v11 = vpop.permute.xlu1 %441 }
 0x333   :  { %v448_v14 = vmul.f32 %v442_v11, %v338_v51 }
 0x335   :  { %v450_v15 = vadd.f32 %v449_v12, %v448_v14  ;;  %v212_v12 = vadd.f32 %v4169_v57, %v4114_v31 }
 0x336   :  { %v446_v18 = vpop.permute.xlu1 %445 }
 0x337   :  { %3730 = vtanh.f32 %v450_v15 }
 0x341   :  { %v3731_v17 = vpop.eup %3730 }
 0x342   :  { %v4182_v20 = vmul.f32 %v3731_v17, %v446_v18 }
 0x344   :  { %2729 = vmatmul.mubr.f32.vlgmr.msra.gmra.mrb[2].mxu1 %v4182_v20 }
 0x345   :  { %3363 = vmatpush3.bf16.msra.mxu1 %v4030_v5  ;;  %2798 = vmatprep.mubr.msk.f32.mxu1 %vm3920_vm0, %v3921_v1 }
 0x346   :  { %3364 = vmatprep.subr.bf16.mxu1 %v3919_v0 }
 0x349   :  { %3366 = vmatpush3.bf16.msra.mxu1 %v4033_v7 }
 0x34a   :  { %3367 = vmatprep.subr.bf16.mxu1 %v3919_v0 }
 0x34d   :  { %3369 = vmatpush3.bf16.msra.mxu1 %v4047_v13 }
 0x34e   :  { %3370 = vmatprep.subr.bf16.mxu1 %v3919_v0 }
 0x351   :  { %3372 = vmatpush3.bf16.msra.mxu1 %v4055_v16 }
 0x352   :  { %3373 = vmatprep.subr.bf16.mxu1 %v3919_v0 }
 0x355   :  { %3375 = vmatpush3.bf16.msra.mxu1 %v4061_v19 }
 0x356   :  { %3376 = vmatprep.subr.bf16.mxu1 %v3919_v0 }
 0x359   :  { %3378 = vmatpush3.bf16.msra.mxu1 %v4067_v22 }
 0x35a   :  { %3379 = vmatprep.subr.bf16.mxu1 %v3919_v0 }
 0x35d   :  { %3381 = vmatpush3.bf16.msra.mxu1 %v4073_v25 }
 0x35e   :  { %3382 = vmatprep.subr.bf16.mxu1 %v3919_v0 }
 0x361   :  { %3384 = vmatpush3.bf16.msra.mxu1 %v4079_v28 }
 0x362   :  { %3409 = vmatprep.subr.bf16.mxu1 %v3919_v0 }
 0x417   :  { %v542_v23 = vpop.f32.mrb[2].mxu1 }
 0x418   :  { %v546_v24 = vadd.f32 %v542_v23, %v197_v21  ;;  %v2730_v26 = vpop.f32.mrb[3].mxu1 }
 0x41a   :  { %v2274_v27 = vmul.f32 -1.442695, %v546_v24  ;;  %3732 = vtanh.f32 %v546_v24 }
 0x41c   :  { %3734 = vpow2.f32 %v2274_v27  ;;  %v1145_v27 = vld [vmem:[#allocation8] sm:$0xff] }
 0x424   :  { %v3733_v29 = vpop.eup %3732 }
 0x425   :  { %556 = vrot.lane.b32.xlu1 %v3733_v29, %s3924_s24  ;;  %v1146_v29 = vld [vmem:[#allocation8 + $0x8] sm:$0xff] }
 0x426   :  { %v3735_v30 = vpop.eup %3734 }
 0x427   :  { %v550_v32 = vadd.f32 1.0, %v3735_v30  ;;  %v3457_v30 = vpack.c.bf16 %v1146_v29, %v1145_v27  ;;  %v1039_v29 = vld [vmem:[#allocation6 + $0x70] sm:$0xff] }
 0x429   :  { %3736 = vrcp.f32 %v550_v32 }
 0x433   :  { %v3737_v33 = vpop.eup %3736 }
 0x434   :  { %554 = vrot.lane.b32.xlu0 %v3737_v33, %s3923_s19 }
 0x438   :  { %558 = vrot.lane.b32.xlu0 %v3737_v33, %s3922_s18 }
 0x497   :  { %v557_v34 = vpop.permute.xlu1 %556 }
 0x498   :  { %v562_v36 = vmul.f32 %v3737_v33, %v557_v34 }
 0x4a6   :  { %v555_v35 = vpop.permute.xlu0 %554 }
 0x4a7   :  { %v561_v37 = vmul.f32 %v555_v35, %v450_v15 }
 0x4a9   :  { %v563_v38 = vadd.f32 %v562_v36, %v561_v37  ;;  %v1147_v36 = vld [vmem:[#allocation8 + $0x10] sm:$0xff]  ;;  %v1148_v37 = vld [vmem:[#allocation8 + $0x18] sm:$0xff] }
 0x4aa   :  { %v559_v40 = vpop.permute.xlu0 %558 }
 0x4ab   :  { %3738 = vtanh.f32 %v563_v38 }
 0x4b5   :  { %v3739_v39 = vpop.eup %3738 }
 0x4b6   :  { %v4207_v41 = vmul.f32 %v3739_v39, %v559_v40 }
 0x4b8   :  { %2764 = vmatmul.mubr.f32.vlgmr.msra.gmra.mrb[10].mxu0 %v4207_v41 }
 0x4b9   :  { %3387 = vmatpush3.bf16.msra.mxu0 %v4030_v5  ;;  %2833 = vmatprep.mubr.msk.f32.mxu0 %vm3920_vm0, %v3921_v1 }
 0x4ba   :  { %3388 = vmatprep.subr.bf16.mxu0 %v3919_v0 }
 0x4bd   :  { %3390 = vmatpush3.bf16.msra.mxu0 %v4033_v7 }
 0x4be   :  { %3391 = vmatprep.subr.bf16.mxu0 %v3919_v0 }
 0x4c1   :  { %3393 = vmatpush3.bf16.msra.mxu0 %v4047_v13 }
 0x4c2   :  { %3394 = vmatprep.subr.bf16.mxu0 %v3919_v0 }
 0x4c5   :  { %3396 = vmatpush3.bf16.msra.mxu0 %v4055_v16 }
 0x4c6   :  { %3397 = vmatprep.subr.bf16.mxu0 %v3919_v0 }
 0x4c9   :  { %3399 = vmatpush3.bf16.msra.mxu0 %v4061_v19 }
 0x4ca   :  { %3400 = vmatprep.subr.bf16.mxu0 %v3919_v0 }
 0x4cd   :  { %3402 = vmatpush3.bf16.msra.mxu0 %v4067_v22 }
 0x4ce   :  { %3403 = vmatprep.subr.bf16.mxu0 %v3919_v0 }
 0x4d1   :  { %3405 = vmatpush3.bf16.msra.mxu0 %v4073_v25 }
 0x4d2   :  { %3406 = vmatprep.subr.bf16.mxu0 %v3919_v0 }
 0x4d5   :  { %3408 = vmatpush3.bf16.msra.mxu0 %v4079_v28 }
 0x4d6   :  { %3433 = vmatprep.subr.bf16.mxu0 %v3919_v0 }
 0x58b   :  { %v655_v43 = vpop.f32.mrb[10].mxu0 }
 0x58c   :  { %v659_v44 = vadd.f32 %v655_v43, %v202_v42  ;;  %v2765_v45 = vpop.f32.mrb[11].mxu0  ;;  %v3461_v42 = vpack.c.bf16 %v1148_v37, %v1147_v36  ;;  %v1149_v43 = vld [vmem:[#allocation8 + $0x20] sm:$0xff] }
 0x58e   :  { %v2275_v46 = vmul.f32 -1.442695, %v659_v44  ;;  %3740 = vtanh.f32 %v659_v44  ;;  %v1150_v44 = vld [vmem:[#allocation8 + $0x28] sm:$0xff] }
 0x58f   :  { %v3465_v45 = vpack.c.bf16 %v1150_v44, %v1149_v43 }
 0x590   :  { %3742 = vpow2.f32 %v2275_v46  ;;  %v1151_v46 = vld [vmem:[#allocation8 + $0x30] sm:$0xff] }
 0x598   :  { %v3741_v47 = vpop.eup %3740 }
 0x599   :  { %669 = vrot.lane.b32.xlu0 %v3741_v47, %s3924_s24  ;;  %v1152_v47 = vld [vmem:[#allocation8 + $0x38] sm:$0xff] }
 0x59a   :  { %v3743_v48 = vpop.eup %3742 }
 0x59b   :  { %v663_v49 = vadd.f32 1.0, %v3743_v48  ;;  %v3469_v48 = vpack.c.bf16 %v1152_v47, %v1151_v46  ;;  %v1288_v46 = vld [vmem:[#allocation10 + $0x28] sm:$0xff] }
 0x59d   :  { %3744 = vrcp.f32 %v663_v49  ;;  %v1153_v49 = vld [vmem:[#allocation8 + $0x40] sm:$0xff] }
 0x5a7   :  { %v3745_v50 = vpop.eup %3744 }
 0x5a8   :  { %667 = vrot.lane.b32.xlu1 %v3745_v50, %s3923_s19 }
 0x5ac   :  { %671 = vrot.lane.b32.xlu1 %v3745_v50, %s3922_s18 }
 0x60b   :  { %v670_v51 = vpop.permute.xlu0 %669 }
 0x60c   :  { %v675_v53 = vmul.f32 %v3745_v50, %v670_v51  ;;  %v1154_v50 = vld [vmem:[#allocation8 + $0x48] sm:$0xff] }
 0x60d   :  { %v3473_v51 = vpack.c.bf16 %v1154_v50, %v1153_v49  ;;  %v1289_v50 = vld [vmem:[#allocation10 + $0x30] sm:$0xff] }
 0x61a   :  { %v668_v52 = vpop.permute.xlu1 %667 }
 0x61b   :  { %v674_v55 = vmul.f32 %v668_v52, %v563_v38  ;;  %v1155_v52 = vld [vmem:[#allocation8 + $0x50] sm:$0xff] }
 0x61d   :  { %v676_v56 = vadd.f32 %v675_v53, %v674_v55  ;;  %v1156_v53 = vld [vmem:[#allocation8 + $0x58] sm:$0xff] }
 0x61e   :  { %v672_v62 = vpop.permute.xlu1 %671  ;;  %v3477_v55 = vpack.c.bf16 %v1156_v53, %v1155_v52  ;;  %v1291_v53 = vld [vmem:[#allocation10 + $0x40] sm:$0xff] }
 0x61f   :  { %3746 = vtanh.f32 %v676_v56 }
 0x629   :  { %v3747_v61 = vpop.eup %3746 }
 0x62a   :  { %v4233_v63 = vmul.f32 %v3747_v61, %v672_v62  ;;  %v1158_v61 = vld [vmem:[#allocation8 + $0x68] sm:$0xff]  ;;  %v1159_v62 = vld [vmem:[#allocation8 + $0x70] sm:$0xff] }
 0x62c   :  { %2799 = vmatmul.mubr.f32.vlgmr.msra.gmra.mrb[4].mxu1 %v4233_v63 }
 0x62d   :  { %3411 = vmatpush3.bf16.msra.mxu1 %v4030_v5  ;;  %2868 = vmatprep.mubr.msk.f32.mxu1 %vm3920_vm0, %v3921_v1  ;;  %v207_v5 = vadd.f32 %v4114_v31, %v4171_v58 }
 0x62e   :  { %3412 = vmatprep.subr.bf16.mxu1 %v3919_v0 }
 0x631   :  { %3414 = vmatpush3.bf16.msra.mxu1 %v4033_v7 }
 0x632   :  { %3415 = vmatprep.subr.bf16.mxu1 %v3919_v0 }
 0x635   :  { %3417 = vmatpush3.bf16.msra.mxu1 %v4047_v13 }
 0x636   :  { %3418 = vmatprep.subr.bf16.mxu1 %v3919_v0 }
 0x639   :  { %3420 = vmatpush3.bf16.msra.mxu1 %v4055_v16 }
 0x63a   :  { %3421 = vmatprep.subr.bf16.mxu1 %v3919_v0 }
 0x63d   :  { %3423 = vmatpush3.bf16.msra.mxu1 %v4061_v19 }
 0x63e   :  { %3424 = vmatprep.subr.bf16.mxu1 %v3919_v0 }
 0x641   :  { %3426 = vmatpush3.bf16.msra.mxu1 %v4067_v22 }
 0x642   :  { %3427 = vmatprep.subr.bf16.mxu1 %v3919_v0 }
 0x645   :  { %3429 = vmatpush3.bf16.msra.mxu1 %v4073_v25 }
 0x646   :  { %3430 = vmatprep.subr.bf16.mxu1 %v3919_v0 }
 0x649   :  { %3432 = vmatpush3.bf16.msra.mxu1 %v4079_v28 }
 0x64a   :  { %3458 = vmatprep.subr.bf16.mxu1 %v3457_v30 }
 0x6ff   :  { %v768_v7 = vpop.f32.mrb[4].mxu1 }
 0x700   :  { %v772_v13 = vadd.f32 %v768_v7, %v207_v5  ;;  %v2800_v16 = vpop.f32.mrb[5].mxu1  ;;  %v1160_v5 = vld [vmem:[#allocation8 + $0x78] sm:$0xff] }
 0x701   :  { %v3485_v7 = vpack.c.bf16 %v1160_v5, %v1159_v62  ;;  %v1025_v16 = vld [vmem:[#allocation6] sm:$0xff] }
 0x702   :  { %v2276_v2 = vmul.f32 -1.442695, %v772_v13  ;;  %3748 = vtanh.f32 %v772_v13  ;;  %v217_v13 = vadd.f32 %v4114_v31, %v4175_v60  ;;  %v1031_v60 = vld [vmem:[#allocation6 + $0x30] sm:$0xff]  ;;  %v1295_v5 = vld [vmem:[#allocation10 + $0x60] sm:$0xff] }
 0x704   :  { %3750 = vpow2.f32 %v2276_v2  ;;  %v1026_v2 = vld [vmem:[#allocation6 + $0x8] sm:$0xff] }
 0x70c   :  { %v3749_v19 = vpop.eup %3748 }
 0x70d   :  { %782 = vrot.lane.b32.xlu1 %v3749_v19, %s3924_s24 }
 0x70e   :  { %v3751_v22 = vpop.eup %3750 }
 0x70f   :  { %v776_v3 = vadd.f32 1.0, %v3751_v22  ;;  %v3434_v22 = vpack.c.bf16 %v1026_v2, %v1025_v16  ;;  %v1297_v16 = vld [vmem:[#allocation10 + $0x70] sm:$0xff]  ;;  %v1298_v2 = vld [vmem:[#allocation10 + $0x78] sm:$0xff] }
 0x711   :  { %3752 = vrcp.f32 %v776_v3 }
 0x71b   :  { %v3753_v25 = vpop.eup %3752 }
 0x71c   :  { %780 = vrot.lane.b32.xlu0 %v3753_v25, %s3923_s19 }
 0x720   :  { %784 = vrot.lane.b32.xlu0 %v3753_v25, %s3922_s18 }
 0x77f   :  { %v783_v28 = vpop.permute.xlu1 %782 }
 0x780   :  { %v788_v58 = vmul.f32 %v3753_v25, %v783_v28  ;;  %v1027_v28 = vld [vmem:[#allocation6 + $0x10] sm:$0xff] }
 0x78e   :  { %v781_v4 = vpop.permute.xlu0 %780 }
 0x78f   :  { %v787_v6 = vmul.f32 %v781_v4, %v676_v56  ;;  %v1157_v56 = vld [vmem:[#allocation8 + $0x60] sm:$0xff]  ;;  %v1028_v4 = vld [vmem:[#allocation6 + $0x18] sm:$0xff] }
 0x791   :  { %v789_v8 = vadd.f32 %v788_v58, %v787_v6 }
 0x792   :  { %v785_v10 = vpop.permute.xlu0 %784 }
 0x793   :  { %3754 = vtanh.f32 %v789_v8 }
 0x79d   :  { %v3755_v9 = vpop.eup %3754 }
 0x79e   :  { %v4258_v11 = vmul.f32 %v3755_v9, %v785_v10 }
 0x7a0   :  { %2834 = vmatmul.mubr.f32.vlgmr.msra.gmra.mrb[12].mxu0 %v4258_v11 }
 0x7a1   :  { %2903 = vmatprep.mubr.msk.f32.mxu0 %vm3920_vm0, %v3921_v1  ;;  %3435 = vmatpush3.bf16.msra.mxu0 %v3434_v22 }
 0x7a2   :  { %3436 = vmatprep.subr.bf16.mxu0 %v3919_v0 }
 0x873   :  { %v881_v14 = vpop.f32.mrb[12].mxu0 }
 0x874   :  { %v885_v15 = vadd.f32 %v881_v14, %v212_v12  ;;  %v2835_v17 = vpop.f32.mrb[13].mxu0  ;;  %v1033_v12 = vld [vmem:[#allocation6 + $0x40] sm:$0xff]  ;;  %v1034_v14 = vld [vmem:[#allocation6 + $0x48] sm:$0xff] }
 0x875   :  { %v3446_v17 = vpack.c.bf16 %v1034_v14, %v1033_v12  ;;  %v4381_v14 = vld [vmem:[%s4594_s6] ss:$0 sm:$0xff] }
 0x876   :  { %v2277_v18 = vmul.f32 -1.442695, %v885_v15  ;;  %3756 = vtanh.f32 %v885_v15 }
 0x878   :  { %3758 = vpow2.f32 %v2277_v18  ;;  %v1035_v18 = vld [vmem:[#allocation6 + $0x50] sm:$0xff] }
 0x880   :  { %v3757_v21 = vpop.eup %3756 }
 0x881   :  { %895 = vrot.lane.b32.xlu0 %v3757_v21, %s3924_s24  ;;  %v1036_v21 = vld [vmem:[#allocation6 + $0x58] sm:$0xff] }
 0x882   :  { %v3759_v23 = vpop.eup %3758 }
 0x883   :  { %v889_v24 = vadd.f32 1.0, %v3759_v23  ;;  %v3449_v23 = vpack.c.bf16 %v1036_v21, %v1035_v18 }
 0x885   :  { %3760 = vrcp.f32 %v889_v24  ;;  %v1037_v24 = vld [vmem:[#allocation6 + $0x60] sm:$0xff] }
 0x88f   :  { %v3761_v26 = vpop.eup %3760 }
 0x890   :  { %893 = vrot.lane.b32.xlu1 %v3761_v26, %s3923_s19 }
 0x894   :  { %897 = vrot.lane.b32.xlu1 %v3761_v26, %s3922_s18 }
 0x8f3   :  { %v896_v57 = vpop.permute.xlu0 %895 }
 0x8f4   :  { %v901_v33 = vmul.f32 %v3761_v26, %v896_v57  ;;  %v1038_v26 = vld [vmem:[#allocation6 + $0x68] sm:$0xff] }
 0x8f5   :  { %v3452_v27 = vpack.c.bf16 %v1038_v26, %v1037_v24 }
 0x902   :  { %v894_v32 = vpop.permute.xlu1 %893 }
 0x903   :  { %v900_v34 = vmul.f32 %v894_v32, %v789_v8  ;;  %v1032_v8 = vld [vmem:[#allocation6 + $0x38] sm:$0xff] }
 0x904   :  { %v3443_v9 = vpack.c.bf16 %v1032_v8, %v1031_v60 }
 0x905   :  { %v4268_v35 = vadd.f32 %v901_v33, %v900_v34  ;;  %v1283_v33 = vld [vmem:[#allocation10] sm:$0xff]  ;;  %v1284_v34 = vld [vmem:[#allocation10 + $0x8] sm:$0xff] }
 0x906   :  { %v898_v39 = vpop.permute.xlu1 %897  ;;  %v4291_v37 = vpack.c.bf16 %v1284_v34, %v1283_v33 }
 0x907   :  { %3762 = vtanh.f32 %v4268_v35 }
 0x911   :  { %v3763_v38 = vpop.eup %3762 }
 0x912   :  { %v904_v40 = vmul.f32 %v3763_v38, %v898_v39  ;;  %v1285_v39 = vld [vmem:[#allocation10 + $0x10] sm:$0xff] }
 0x914   :  { %2869 = vmatmul.mubr.f32.vlgmr.msra.gmra.mrb[6].mxu1 %v904_v40 }
 0x915   :  { %3460 = vmatpush3.bf16.msra.mxu1 %v3457_v30  ;;  %2938 = vmatprep.mubr.f32.mxu1 %v4146_v54  ;;  %v3481_v54 = vpack.c.bf16 %v1158_v61, %v1157_v56  ;;  %v1040_v30 = vld [vmem:[#allocation6 + $0x78] sm:$0xff]  ;;  %v1293_v61 = vld [vmem:[#allocation10 + $0x50] sm:$0xff] }
 0x916   :  { %3462 = vmatprep.subr.bf16.mxu1 %v3461_v42  ;;  %v3455_v32 = vpack.c.bf16 %v1040_v30, %v1039_v29 }
 0x919   :  { %3464 = vmatpush3.bf16.msra.mxu1 %v3461_v42 }
 0x91a   :  { %3466 = vmatprep.subr.bf16.mxu1 %v3465_v45 }
 0x91d   :  { %3468 = vmatpush3.bf16.msra.mxu1 %v3465_v45  ;;  %v1287_v45 = vld [vmem:[#allocation10 + $0x20] sm:$0xff] }
 0x91e   :  { %3470 = vmatprep.subr.bf16.mxu1 %v3469_v48 }
 0x921   :  { %3472 = vmatpush3.bf16.msra.mxu1 %v3469_v48  ;;  %v4308_v48 = vpack.c.bf16 %v1288_v46, %v1287_v45 }
 0x922   :  { %3474 = vmatprep.subr.bf16.mxu1 %v3473_v51 }
 0x925   :  { %3476 = vmatpush3.bf16.msra.mxu1 %v3473_v51  ;;  %v1290_v51 = vld [vmem:[#allocation10 + $0x38] sm:$0xff] }
 0x926   :  { %3478 = vmatprep.subr.bf16.mxu1 %v3477_v55  ;;  %v4314_v52 = vpack.c.bf16 %v1290_v51, %v1289_v50 }
 0x929   :  { %3480 = vmatpush3.bf16.msra.mxu1 %v3477_v55  ;;  %v1292_v55 = vld [vmem:[#allocation10 + $0x48] sm:$0xff] }
 0x92a   :  { %3482 = vmatprep.subr.bf16.mxu1 %v3481_v54  ;;  %v4318_v56 = vpack.c.bf16 %v1292_v55, %v1291_v53 }
 0x92d   :  { %3484 = vmatpush3.bf16.msra.mxu1 %v3481_v54  ;;  %v1294_v54 = vld [vmem:[#allocation10 + $0x58] sm:$0xff] }
 0x92e   :  { %3486 = vmatprep.subr.bf16.mxu1 %v3485_v7  ;;  %v4322_v62 = vpack.c.bf16 %v1294_v54, %v1293_v61 }
 0x931   :  { %3488 = vmatpush3.bf16.msra.mxu1 %v3485_v7  ;;  %v1296_v7 = vld [vmem:[#allocation10 + $0x68] sm:$0xff] }
 0x932   :  { %3513 = vmatprep.subr.bf16.mxu1 %v3919_v0 }
 0x934   :  { %2939 = vmatmul.mubr.f32.vlgmr.msra.gmra.mrb[8].mxu1 %v4182_v20  ;;  %v3437_v20 = vpack.c.bf16 %v1028_v4, %v1027_v28 }
 0x935   :  { %2941 = vmatprep.mubr.f32.mxu1 %v4207_v41  ;;  %v1029_v41 = vld [vmem:[#allocation6 + $0x20] sm:$0xff]  ;;  %3515 = vmatpush3.bf16.msra.mxu1 %v4291_v37 }
 0x936   :  { %3438 = vmatpush3.bf16.msra.mxu0 %v3437_v20  ;;  %3516 = vmatprep.subr.bf16.mxu1 %v3919_v0 }
 0x937   :  { %3439 = vmatprep.subr.bf16.mxu0 %v3919_v0 }
 0x938   :  { %2942 = vmatmul.mubr.f32.gmra.mrb[10].mxu1 %v4233_v63  ;;  %v1030_v63 = vld [vmem:[#allocation6 + $0x28] sm:$0xff] }
 0x939   :  { %2944 = vmatprep.mubr.f32.mxu1 %v4258_v11  ;;  %v3440_v6 = vpack.c.bf16 %v1030_v63, %v1029_v41 }
 0x93b   :  { %3441 = vmatpush3.bf16.msra.mxu0 %v3440_v6 }
 0x93c   :  { %2945 = vmatmul.mubr.f32.gmra.mrb[12].mxu1 %v904_v40  ;;  %3442 = vmatprep.subr.bf16.mxu0 %v3919_v0  ;;  %v1286_v40 = vld [vmem:[#allocation10 + $0x18] sm:$0xff] }
 0x93d   :  { %v4300_v43 = vpack.c.bf16 %v1286_v40, %v1285_v39 }
 0x93f   :  { %3444 = vmatpush3.bf16.msra.mxu0 %v3443_v9  ;;  %3518 = vmatpush3.bf16.msra.mxu1 %v4300_v43 }
 0x940   :  { %3445 = vmatprep.subr.bf16.mxu0 %v3919_v0  ;;  %3519 = vmatprep.subr.bf16.mxu1 %v3919_v0 }
 0x943   :  { %3447 = vmatpush3.bf16.msra.mxu0 %v3446_v17  ;;  %3521 = vmatpush3.bf16.msra.mxu1 %v4308_v48 }
 0x944   :  { %3448 = vmatprep.subr.bf16.mxu0 %v3919_v0  ;;  %3522 = vmatprep.subr.bf16.mxu1 %v3919_v0 }
 0x947   :  { %3450 = vmatpush3.bf16.msra.mxu0 %v3449_v23  ;;  %3524 = vmatpush3.bf16.msra.mxu1 %v4314_v52 }
 0x948   :  { %3451 = vmatprep.subr.bf16.mxu0 %v3919_v0  ;;  %3525 = vmatprep.subr.bf16.mxu1 %v3919_v0 }
 0x94b   :  { %3453 = vmatpush3.bf16.msra.mxu0 %v3452_v27  ;;  %3527 = vmatpush3.bf16.msra.mxu1 %v4318_v56 }
 0x94c   :  { %3454 = vmatprep.subr.bf16.mxu0 %v3919_v0  ;;  %3528 = vmatprep.subr.bf16.mxu1 %v3919_v0 }
 0x94f   :  { %3456 = vmatpush3.bf16.msra.mxu0 %v3455_v32  ;;  %3530 = vmatpush3.bf16.msra.mxu1 %v4322_v62 }
 0x950   :  { %3489 = vmatprep.subr.bf16.mxu0 %v3919_v0  ;;  %3531 = vmatprep.subr.bf16.mxu1 %v3919_v0 }
 0x9e7   :  { %v994_v19 = vpop.f32.mrb[6].mxu1 }
 0x9e8   :  { %v998_v3 = vadd.f32 %v994_v19, %v217_v13  ;;  %v2870_v25 = vpop.f32.mrb[7].mxu1  ;;  %v4326_v13 = vpack.c.bf16 %v1296_v7, %v1295_v5  ;;  %v4330_v19 = vpack.c.bf16 %v1298_v2, %v1297_v16 }
 0x9ea   :  { %v2278_v58 = vmul.f32 -1.442695, %v998_v3  ;;  %3764 = vtanh.f32 %v998_v3  ;;  %3533 = vmatpush3.bf16.msra.mxu1 %v4326_v13 }
 0x9eb   :  { %3534 = vmatprep.subr.bf16.mxu1 %v3919_v0 }
 0x9ec   :  { %3766 = vpow2.f32 %v2278_v58 }
 0x9ee   :  { %3536 = vmatpush3.bf16.msra.mxu1 %v4330_v19 }
 0x9ef   :  { %3561 = vmatprep.subr.bf16.mxu1 %v3919_v0 }
 0x9f4   :  { %v3765_v10 = vpop.eup %3764 }
 0x9f5   :  { %1008 = vrot.lane.b32.xlu1 %v3765_v10, %s3924_s24 }
 0x9f6   :  { %v3767_v11 = vpop.eup %3766 }
 0x9f7   :  { %v1002_v15 = vadd.f32 1.0, %v3767_v11 }
 0x9f9   :  { %3768 = vrcp.f32 %v1002_v15 }
 0xa03   :  { %v3769_v57 = vpop.eup %3768 }
 0xa04   :  { %1006 = vrot.lane.b32.xlu0 %v3769_v57, %s3923_s19 }
 0xa07   :  { %v4289_v36 = vpop.f32.mrb[8].mxu1 }
 0xa08   :  { %v4293_v38 = vpop.f32.mrb[9].mxu1  ;;  %1010 = vrot.lane.b32.xlu0 %v3769_v57, %s3922_s18  ;;  %v1240_v5 = vadd.f32 %v4289_v36, %v4381_v14 }
 0xa0b   :  { %v4298_v42 = vpop.f32.mrb[10].mxu1 }
 0xa0c   :  { %v4302_v44 = vpop.f32.mrb[11].mxu1 }
 0xa0f   :  { %v4306_v47 = vpop.f32.mrb[12].mxu1 }
 0xa10   :  { %v4310_v49 = vpop.f32.mrb[13].mxu1 }
 0xa67   :  { %v1009_v22 = vpop.permute.xlu1 %1008 }
 0xa68   :  { %v1014_v25 = vmul.f32 %v3769_v57, %v1009_v22 }
 0xa76   :  { %v1007_v3 = vpop.permute.xlu0 %1006 }
 0xa77   :  { %v1013_v28 = vmul.f32 %v1007_v3, %v4268_v35  ;;  %v222_v35 = vadd.f32 %v4173_v59, %v4114_v31  ;;  %v1235_v31 = vadd.f32 %v4381_v14, %v4293_v38 }
 0xa79   :  { %v4335_v4 = vadd.f32 %v1014_v25, %v1013_v28 }
 0xa7a   :  { %v1011_v58 = vpop.permute.xlu0 %1010 }
 0xa7b   :  { %3770 = vtanh.f32 %v4335_v4 }
 0xa85   :  { %v3771_v20 = vpop.eup %3770 }
 0xa86   :  { %v1017_v41 = vmul.f32 %v3771_v20, %v1011_v58 }
 0xa88   :  { %2904 = vmatmul.mubr.f32.vlgmr.msra.gmra.mrb[14].mxu0 %v1017_v41  ;;  %2947 = vmatprep.mubr.f32.mxu1 %v1017_v41 }
 0xa89   :  { %3491 = vmatpush3.bf16.msra.mxu0 %v4291_v37  ;;  %2982 = vmatprep.mubr.msk.f32.mxu0 %vm3920_vm0, %v3921_v1 }
 0xa8a   :  { %3492 = vmatprep.subr.bf16.mxu0 %v3919_v0 }
 0xa8d   :  { %3494 = vmatpush3.bf16.msra.mxu0 %v4300_v43 }
 0xa8e   :  { %3495 = vmatprep.subr.bf16.mxu0 %v3919_v0 }
 0xa91   :  { %3497 = vmatpush3.bf16.msra.mxu0 %v4308_v48 }
 0xa92   :  { %3498 = vmatprep.subr.bf16.mxu0 %v3919_v0 }
 0xa95   :  { %3500 = vmatpush3.bf16.msra.mxu0 %v4314_v52 }
 0xa96   :  { %3501 = vmatprep.subr.bf16.mxu0 %v3919_v0 }
 0xa99   :  { %3503 = vmatpush3.bf16.msra.mxu0 %v4318_v56 }
 0xa9a   :  { %3504 = vmatprep.subr.bf16.mxu0 %v3919_v0 }
 0xa9d   :  { %3506 = vmatpush3.bf16.msra.mxu0 %v4322_v62 }
 0xa9e   :  { %3507 = vmatprep.subr.bf16.mxu0 %v3919_v0 }
 0xaa1   :  { %3509 = vmatpush3.bf16.msra.mxu0 %v4326_v13 }
 0xaa2   :  { %3510 = vmatprep.subr.bf16.mxu0 %v3919_v0 }
 0xaa5   :  { %3512 = vmatpush3.bf16.msra.mxu0 %v4330_v19 }
 0xaa6   :  { %3537 = vmatprep.subr.bf16.mxu0 %v3919_v0 }
 0xaa8   :  { %2983 = vmatmul.mubr.f32.vlgmr.msra.gmra.mrb[16].mxu0 %v3921_v1 }
 0xaa9   :  { %3539 = vmatpush3.bf16.msra.mxu0 %v4291_v37  ;;  %3052 = vmatprep.mubr.msk.f32.mxu0 %vm3920_vm0, %v3921_v1 }
 0xaaa   :  { %3540 = vmatprep.subr.bf16.mxu0 %v3919_v0 }
 0xaad   :  { %3542 = vmatpush3.bf16.msra.mxu0 %v4300_v43 }
 0xaae   :  { %3543 = vmatprep.subr.bf16.mxu0 %v3919_v0 }
 0xab1   :  { %3545 = vmatpush3.bf16.msra.mxu0 %v4308_v48 }
 0xab2   :  { %3546 = vmatprep.subr.bf16.mxu0 %v3919_v0 }
 0xab5   :  { %3548 = vmatpush3.bf16.msra.mxu0 %v4314_v52 }
 0xab6   :  { %3549 = vmatprep.subr.bf16.mxu0 %v3919_v0 }
 0xab9   :  { %3551 = vmatpush3.bf16.msra.mxu0 %v4318_v56 }
 0xaba   :  { %3552 = vmatprep.subr.bf16.mxu0 %v3919_v0 }
 0xabd   :  { %3554 = vmatpush3.bf16.msra.mxu0 %v4322_v62 }
 0xabe   :  { %3555 = vmatprep.subr.bf16.mxu0 %v3919_v0 }
 0xac1   :  { %3557 = vmatpush3.bf16.msra.mxu0 %v4326_v13 }
 0xac2   :  { %3558 = vmatprep.subr.bf16.mxu0 %v3919_v0 }
 0xac5   :  { %3560 = vmatpush3.bf16.msra.mxu0 %v4330_v19 }
 0xac6   :  { %3585 = vmatprep.subr.bf16.mxu0 %v3919_v0 }
 0xb5b   :  { %v1107_v63 = vpop.f32.mrb[14].mxu0 }
 0xb5c   :  { %v1111_v6 = vadd.f32 %v1107_v63, %v222_v35  ;;  %v2905_v60 = vpop.f32.mrb[15].mxu0 }
 0xb5e   :  { %v2279_v8 = vmul.f32 -1.442695, %v1111_v6  ;;  %3772 = vtanh.f32 %v1111_v6 }
 0xb60   :  { %3774 = vpow2.f32 %v2279_v8  ;;  %v1245_v8 = vadd.f32 %v4381_v14, %v4302_v44 }
 0xb68   :  { %v3773_v9 = vpop.eup %3772 }
 0xb69   :  { %1121 = vrot.lane.b32.xlu0 %v3773_v9, %s3924_s24 }
 0xb6a   :  { %v3775_v10 = vpop.eup %3774 }
 0xb6b   :  { %v1115_v11 = vadd.f32 1.0, %v3775_v10 }
 0xb6d   :  { %3776 = vrcp.f32 %v1115_v11 }
 0xb77   :  { %v3777_v12 = vpop.eup %3776 }
 0xb78   :  { %1119 = vrot.lane.b32.xlu1 %v3777_v12, %s3923_s19 }
 0xb7b   :  { %v1365_v59 = vpop.f32.mrb[16].mxu0 }
 0xb7c   :  { %v1369_v15 = vadd.f32 %v1365_v59, %v1235_v31  ;;  %v2984_v17 = vpop.f32.mrb[17].mxu0 }
 0xb7e   :  { %v2281_v18 = vmul.f32 -1.442695, %v1369_v15  ;;  %3778 = vtanh.f32 %v1369_v15 }
 0xb80   :  { %3780 = vpow2.f32 %v2281_v18 }
 0xb88   :  { %v3779_v21 = vpop.eup %3778 }
 0xb89   :  { %1379 = vrot.lane.b32.xlu0 %v3779_v21, %s3924_s24 }
 0xb8a   :  { %v3781_v23 = vpop.eup %3780 }
 0xb8b   :  { %v1373_v24 = vadd.f32 1.0, %v3781_v23 }
 0xb8d   :  { %3782 = vrcp.f32 %v1373_v24 }
 0xb97   :  { %v3783_v26 = vpop.eup %3782 }
 0xb98   :  { %1381 = vrot.lane.b32.xlu0 %v3783_v26, %s3922_s18  ;;  %1377 = vrot.lane.b32.xlu1 %v3783_v26, %s3923_s19 }
 0xb9c   :  { %1123 = vrot.lane.b32.xlu1 %v3777_v12, %s3922_s18 }
 0xbdb   :  { %v1122_v29 = vpop.permute.xlu0 %1121 }
 0xbdc   :  { %v1127_v57 = vmul.f32 %v3777_v12, %v1122_v29 }
 0xbea   :  { %v1120_v27 = vpop.permute.xlu1 %1119 }
 0xbeb   :  { %v1126_v30 = vmul.f32 %v1120_v27, %v4335_v4 }
 0xbed   :  { %v1128_v32 = vadd.f32 %v1127_v57, %v1126_v30  ;;  %v1250_v30 = vadd.f32 %v4298_v42, %v4381_v14 }
 0xbef   :  { %3784 = vtanh.f32 %v1128_v32 }
 0xbf9   :  { %v3785_v45 = vpop.eup %3784 }
 0xbfb   :  { %v1380_v33 = vpop.permute.xlu0 %1379 }
 0xbfc   :  { %v1385_v38 = vmul.f32 %v3783_v26, %v1380_v33 }
 0xc0a   :  { %v1378_v34 = vpop.permute.xlu1 %1377  ;;  %v1382_v53 = vpop.permute.xlu0 %1381 }
 0xc0b   :  { %v1384_v39 = vmul.f32 0.0, %v1378_v34 }
 0xc0d   :  { %v1386_v40 = vadd.f32 %v1385_v38, %v1384_v39 }
 0xc0e   :  { %v1124_v46 = vpop.permute.xlu1 %1123 }
 0xc0f   :  { %3786 = vtanh.f32 %v1386_v40  ;;  %v1130_v50 = vmul.f32 %v3785_v45, %v1124_v46 }
 0xc11   :  { %2948 = vmatmul.mubr.f32.gmra.mrb[14].mxu1 %v1130_v50 }
 0xc12   :  { %3017 = vmatprep.mubr.msk.f32.mxu1 %vm3920_vm0, %v3921_v1 }
 0xc19   :  { %v3787_v51 = vpop.eup %3786 }
 0xc1a   :  { %v1388_v55 = vmul.f32 %v3787_v51, %v1382_v53 }
 0xc1c   :  { %3018 = vmatmul.mubr.f32.vlgmr.msra.gmra.mrb[16].mxu1 %v1388_v55 }
 0xc1d   :  { %3563 = vmatpush3.bf16.msra.mxu1 %v4291_v37  ;;  %3087 = vmatprep.mubr.msk.f32.mxu1 %vm3920_vm0, %v3921_v1 }
 0xc1e   :  { %3564 = vmatprep.subr.bf16.mxu1 %v3919_v0 }
 0xc21   :  { %3566 = vmatpush3.bf16.msra.mxu1 %v4300_v43 }
 0xc22   :  { %3567 = vmatprep.subr.bf16.mxu1 %v3919_v0 }
 0xc25   :  { %3569 = vmatpush3.bf16.msra.mxu1 %v4308_v48 }
 0xc26   :  { %3570 = vmatprep.subr.bf16.mxu1 %v3919_v0 }
 0xc29   :  { %3572 = vmatpush3.bf16.msra.mxu1 %v4314_v52 }
 0xc2a   :  { %3573 = vmatprep.subr.bf16.mxu1 %v3919_v0 }
 0xc2d   :  { %3575 = vmatpush3.bf16.msra.mxu1 %v4318_v56 }
 0xc2e   :  { %3576 = vmatprep.subr.bf16.mxu1 %v3919_v0 }
 0xc31   :  { %3578 = vmatpush3.bf16.msra.mxu1 %v4322_v62 }
 0xc32   :  { %3579 = vmatprep.subr.bf16.mxu1 %v3919_v0 }
 0xc35   :  { %3581 = vmatpush3.bf16.msra.mxu1 %v4326_v13 }
 0xc36   :  { %3582 = vmatprep.subr.bf16.mxu1 %v3919_v0 }
 0xc39   :  { %3584 = vmatpush3.bf16.msra.mxu1 %v4330_v19 }
 0xc3a   :  { %3609 = vmatprep.subr.bf16.mxu1 %v3919_v0 }
 0xce4   :  { %v4411_v61 = vpop.f32.mrb[14].mxu1 }
 0xce5   :  { %v4413_v54 = vpop.f32.mrb[15].mxu1 }
 0xcef   :  { %v1475_v7 = vpop.f32.mrb[16].mxu1 }
 0xcf0   :  { %v1479_v16 = vadd.f32 %v1475_v7, %v1240_v5  ;;  %v3019_v2 = vpop.f32.mrb[17].mxu1 }
 0xcf2   :  { %v2282_v22 = vmul.f32 -1.442695, %v1479_v16  ;;  %3788 = vtanh.f32 %v1479_v16  ;;  %v1255_v16 = vadd.f32 %v4381_v14, %v4310_v49 }
 0xcf4   :  { %3790 = vpow2.f32 %v2282_v22 }
 0xcfc   :  { %v3789_v3 = vpop.eup %3788 }
 0xcfd   :  { %1489 = vrot.lane.b32.xlu0 %v3789_v3, %s3924_s24 }
 0xcfe   :  { %v3791_v25 = vpop.eup %3790 }
 0xcff   :  { %v1483_v28 = vadd.f32 1.0, %v3791_v25 }
 0xd01   :  { %3792 = vrcp.f32 %v1483_v28 }
 0xd0b   :  { %v3793_v4 = vpop.eup %3792 }
 0xd0c   :  { %1487 = vrot.lane.b32.xlu1 %v3793_v4, %s3923_s19 }
 0xd10   :  { %1491 = vrot.lane.b32.xlu1 %v3793_v4, %s3922_s18 }
 0xd6f   :  { %v1490_v20 = vpop.permute.xlu0 %1489 }
 0xd70   :  { %v1495_v36 = vmul.f32 %v3793_v4, %v1490_v20 }
 0xd7e   :  { %v1488_v58 = vpop.permute.xlu1 %1487 }
 0xd7f   :  { %v1494_v41 = vmul.f32 %v1488_v58, %v1386_v40 }
 0xd81   :  { %v1496_v35 = vadd.f32 %v1495_v36, %v1494_v41 }
 0xd82   :  { %v1492_v6 = vpop.permute.xlu1 %1491 }
 0xd83   :  { %3794 = vtanh.f32 %v1496_v35 }
 0xd8d   :  { %v3795_v63 = vpop.eup %3794 }
 0xd8e   :  { %v1498_v60 = vmul.f32 %v3795_v63, %v1492_v6 }
 0xd90   :  { %3053 = vmatmul.mubr.f32.vlgmr.msra.gmra.mrb[18].mxu0 %v1498_v60 }
 0xd91   :  { %3587 = vmatpush3.bf16.msra.mxu0 %v4291_v37  ;;  %3122 = vmatprep.mubr.msk.f32.mxu0 %vm3920_vm0, %v3921_v1 }
 0xd92   :  { %3588 = vmatprep.subr.bf16.mxu0 %v3919_v0 }
 0xd95   :  { %3590 = vmatpush3.bf16.msra.mxu0 %v4300_v43 }
 0xd96   :  { %3591 = vmatprep.subr.bf16.mxu0 %v3919_v0 }
 0xd99   :  { %3593 = vmatpush3.bf16.msra.mxu0 %v4308_v48 }
 0xd9a   :  { %3594 = vmatprep.subr.bf16.mxu0 %v3919_v0 }
 0xd9d   :  { %3596 = vmatpush3.bf16.msra.mxu0 %v4314_v52 }
 0xd9e   :  { %3597 = vmatprep.subr.bf16.mxu0 %v3919_v0 }
 0xda1   :  { %3599 = vmatpush3.bf16.msra.mxu0 %v4318_v56 }
 0xda2   :  { %3600 = vmatprep.subr.bf16.mxu0 %v3919_v0 }
 0xda5   :  { %3602 = vmatpush3.bf16.msra.mxu0 %v4322_v62 }
 0xda6   :  { %3603 = vmatprep.subr.bf16.mxu0 %v3919_v0 }
 0xda9   :  { %3605 = vmatpush3.bf16.msra.mxu0 %v4326_v13 }
 0xdaa   :  { %3606 = vmatprep.subr.bf16.mxu0 %v3919_v0 }
 0xdad   :  { %3608 = vmatpush3.bf16.msra.mxu0 %v4330_v19 }
 0xdae   :  { %3633 = vmatprep.subr.bf16.mxu0 %v3919_v0 }
 0xe63   :  { %v1585_v9 = vpop.f32.mrb[18].mxu0 }
 0xe64   :  { %v1589_v10 = vadd.f32 %v1585_v9, %v1245_v8  ;;  %v3054_v11 = vpop.f32.mrb[19].mxu0 }
 0xe66   :  { %v2283_v12 = vmul.f32 -1.442695, %v1589_v10  ;;  %3796 = vtanh.f32 %v1589_v10 }
 0xe68   :  { %3798 = vpow2.f32 %v2283_v12 }
 0xe70   :  { %v3797_v31 = vpop.eup %3796 }
 0xe71   :  { %1599 = vrot.lane.b32.xlu1 %v3797_v31, %s3924_s24 }
 0xe72   :  { %v3799_v59 = vpop.eup %3798 }
 0xe73   :  { %v1593_v15 = vadd.f32 1.0, %v3799_v59 }
 0xe75   :  { %3800 = vrcp.f32 %v1593_v15 }
 0xe7f   :  { %v3801_v17 = vpop.eup %3800 }
 0xe80   :  { %1597 = vrot.lane.b32.xlu0 %v3801_v17, %s3923_s19 }
 0xe84   :  { %1601 = vrot.lane.b32.xlu0 %v3801_v17, %s3922_s18 }
 0xee3   :  { %v1600_v18 = vpop.permute.xlu1 %1599 }
 0xee4   :  { %v1605_v44 = vmul.f32 %v3801_v17, %v1600_v18  ;;  %v1265_v18 = vadd.f32 %v4381_v14, %v4413_v54 }
 0xef2   :  { %v1598_v21 = vpop.permute.xlu0 %1597 }
 0xef3   :  { %v1604_v23 = vmul.f32 %v1598_v21, %v1496_v35 }
 0xef5   :  { %v1606_v24 = vadd.f32 %v1605_v44, %v1604_v23 }
 0xef6   :  { %v1602_v27 = vpop.permute.xlu0 %1601 }
 0xef7   :  { %3802 = vtanh.f32 %v1606_v24 }
 0xf01   :  { %v3803_v26 = vpop.eup %3802 }
 0xf02   :  { %v1608_v29 = vmul.f32 %v3803_v26, %v1602_v27 }
 0xf04   :  { %3088 = vmatmul.mubr.f32.vlgmr.msra.gmra.mrb[18].mxu1 %v1608_v29 }
 0xf05   :  { %3611 = vmatpush3.bf16.msra.mxu1 %v4291_v37  ;;  %3157 = vmatprep.mubr.msk.f32.mxu1 %vm3920_vm0, %v3921_v1 }
 0xf06   :  { %3612 = vmatprep.subr.bf16.mxu1 %v3919_v0 }
 0xf09   :  { %3614 = vmatpush3.bf16.msra.mxu1 %v4300_v43 }
 0xf0a   :  { %3615 = vmatprep.subr.bf16.mxu1 %v3919_v0 }
 0xf0d   :  { %3617 = vmatpush3.bf16.msra.mxu1 %v4308_v48 }
 0xf0e   :  { %3618 = vmatprep.subr.bf16.mxu1 %v3919_v0 }
 0xf11   :  { %3620 = vmatpush3.bf16.msra.mxu1 %v4314_v52 }
 0xf12   :  { %3621 = vmatprep.subr.bf16.mxu1 %v3919_v0 }
 0xf15   :  { %3623 = vmatpush3.bf16.msra.mxu1 %v4318_v56 }
 0xf16   :  { %3624 = vmatprep.subr.bf16.mxu1 %v3919_v0 }
 0xf19   :  { %3626 = vmatpush3.bf16.msra.mxu1 %v4322_v62 }
 0xf1a   :  { %3627 = vmatprep.subr.bf16.mxu1 %v3919_v0 }
 0xf1d   :  { %3629 = vmatpush3.bf16.msra.mxu1 %v4326_v13 }
 0xf1e   :  { %3630 = vmatprep.subr.bf16.mxu1 %v3919_v0 }
 0xf21   :  { %3632 = vmatpush3.bf16.msra.mxu1 %v4330_v19 }
 0xf22   :  { %3657 = vmatprep.subr.bf16.mxu1 %v3919_v0 }
 0xfd7   :  { %v1695_v57 = vpop.f32.mrb[18].mxu1 }
 0xfd8   :  { %v1699_v32 = vadd.f32 %v1695_v57, %v1250_v30  ;;  %v3089_v33 = vpop.f32.mrb[19].mxu1 }
 0xfda   :  { %v2284_v34 = vmul.f32 -1.442695, %v1699_v32  ;;  %3804 = vtanh.f32 %v1699_v32 }
 0xfdc   :  { %3806 = vpow2.f32 %v2284_v34 }
 0xfe4   :  { %v3805_v38 = vpop.eup %3804 }
 0xfe5   :  { %1709 = vrot.lane.b32.xlu0 %v3805_v38, %s3924_s24 }
 0xfe6   :  { %v3807_v39 = vpop.eup %3806 }
 0xfe7   :  { %v1703_v40 = vadd.f32 1.0, %v3807_v39 }
 0xfe9   :  { %3808 = vrcp.f32 %v1703_v40  ;;  %v1270_v40 = vadd.f32 %v4411_v61, %v4381_v14 }
 0xff3   :  { %v3809_v45 = vpop.eup %3808 }
 0xff4   :  { %1707 = vrot.lane.b32.xlu1 %v3809_v45, %s3923_s19 }
 0xff8   :  { %1711 = vrot.lane.b32.xlu1 %v3809_v45, %s3922_s18 }
0x1057   :  { %v1710_v46 = vpop.permute.xlu0 %1709 }
0x1058   :  { %v1715_v42 = vmul.f32 %v3809_v45, %v1710_v46  ;;  %v2162_v45 = vld [vmem:[%s4595_s7] sm:$0xff]  ;;  %v2163_v46 = vld [vmem:[%s4595_s7 + $0x8] sm:$0xff] }
0x1066   :  { %v1708_v50 = vpop.permute.xlu1 %1707 }
0x1067   :  { %v1714_v51 = vmul.f32 %v1708_v50, %v1606_v24 }
0x1069   :  { %v1716_v53 = vadd.f32 %v1715_v42, %v1714_v51  ;;  %v3682_v42 = vpack.c.bf16 %v2163_v46, %v2162_v45 }
0x106a   :  { %v1712_v5 = vpop.permute.xlu1 %1711 }
0x106b   :  { %3810 = vtanh.f32 %v1716_v53 }
0x1075   :  { %v3811_v55 = vpop.eup %3810 }
0x1076   :  { %v1718_v7 = vmul.f32 %v3811_v55, %v1712_v5  ;;  %v2164_v55 = vld [vmem:[%s4595_s7 + $0x10] sm:$0xff] }
0x1078   :  { %3123 = vmatmul.mubr.f32.vlgmr.msra.gmra.mrb[20].mxu0 %v1718_v7  ;;  %v2166_v7 = vld [vmem:[%s4595_s7 + $0x20] sm:$0xff] }
0x1079   :  { %3635 = vmatpush3.bf16.msra.mxu0 %v4291_v37  ;;  %3192 = vmatprep.mubr.msk.f32.mxu0 %vm3920_vm0, %v3921_v1 }
0x107a   :  { %3636 = vmatprep.subr.bf16.mxu0 %v3919_v0 }
0x107d   :  { %3638 = vmatpush3.bf16.msra.mxu0 %v4300_v43 }
0x107e   :  { %3639 = vmatprep.subr.bf16.mxu0 %v3919_v0 }
0x1081   :  { %3641 = vmatpush3.bf16.msra.mxu0 %v4308_v48 }
0x1082   :  { %3642 = vmatprep.subr.bf16.mxu0 %v3919_v0 }
0x1085   :  { %3644 = vmatpush3.bf16.msra.mxu0 %v4314_v52 }
0x1086   :  { %3645 = vmatprep.subr.bf16.mxu0 %v3919_v0 }
0x1089   :  { %3647 = vmatpush3.bf16.msra.mxu0 %v4318_v56 }
0x108a   :  { %3648 = vmatprep.subr.bf16.mxu0 %v3919_v0 }
0x108d   :  { %3650 = vmatpush3.bf16.msra.mxu0 %v4322_v62 }
0x108e   :  { %3651 = vmatprep.subr.bf16.mxu0 %v3919_v0 }
0x1091   :  { %3653 = vmatpush3.bf16.msra.mxu0 %v4326_v13 }
0x1092   :  { %3654 = vmatprep.subr.bf16.mxu0 %v3919_v0 }
0x1095   :  { %3656 = vmatpush3.bf16.msra.mxu0 %v4330_v19 }
0x1096   :  { %3681 = vmatprep.subr.bf16.mxu0 %v3919_v0 }
0x114b   :  { %v1805_v2 = vpop.f32.mrb[20].mxu0 }
0x114c   :  { %v1809_v22 = vadd.f32 %v1805_v2, %v1255_v16  ;;  %v3124_v3 = vpop.f32.mrb[21].mxu0  ;;  %v2167_v16 = vld [vmem:[%s4595_s7 + $0x28] sm:$0xff] }
0x114d   :  { %v3688_v2 = vpack.c.bf16 %v2167_v16, %v2166_v7  ;;  %v2169_v3 = vld [vmem:[%s4595_s7 + $0x38] sm:$0xff] }
0x114e   :  { %v2285_v25 = vmul.f32 -1.442695, %v1809_v22  ;;  %3812 = vtanh.f32 %v1809_v22  ;;  %v2168_v22 = vld [vmem:[%s4595_s7 + $0x30] sm:$0xff] }
0x1150   :  { %3814 = vpow2.f32 %v2285_v25  ;;  %v3691_v25 = vpack.c.bf16 %v2169_v3, %v2168_v22 }
0x1158   :  { %v3813_v28 = vpop.eup %3812 }
0x1159   :  { %1819 = vrot.lane.b32.xlu1 %v3813_v28, %s3924_s24 }
0x115a   :  { %v3815_v4 = vpop.eup %3814 }
0x115b   :  { %v1813_v20 = vadd.f32 1.0, %v3815_v4 }
0x115d   :  { %3816 = vrcp.f32 %v1813_v20  ;;  %v2170_v20 = vld [vmem:[%s4595_s7 + $0x40] sm:$0xff] }
0x1167   :  { %v3817_v58 = vpop.eup %3816 }
0x1168   :  { %1817 = vrot.lane.b32.xlu0 %v3817_v58, %s3923_s19 }
0x116c   :  { %1821 = vrot.lane.b32.xlu0 %v3817_v58, %s3922_s18 }
0x11cb   :  { %v1820_v36 = vpop.permute.xlu1 %1819 }
0x11cc   :  { %v1825_v49 = vmul.f32 %v3817_v58, %v1820_v36  ;;  %v2171_v58 = vld [vmem:[%s4595_s7 + $0x48] sm:$0xff] }
0x11da   :  { %v1818_v41 = vpop.permute.xlu0 %1817 }
0x11db   :  { %v1824_v35 = vmul.f32 %v1818_v41, %v1716_v53  ;;  %v3694_v41 = vpack.c.bf16 %v2171_v58, %v2170_v20 }
0x11dd   :  { %v1826_v63 = vadd.f32 %v1825_v49, %v1824_v35  ;;  %v2172_v49 = vld [vmem:[%s4595_s7 + $0x50] sm:$0xff]  ;;  %v2173_v35 = vld [vmem:[%s4595_s7 + $0x58] sm:$0xff] }
0x11de   :  { %v1822_v60 = vpop.permute.xlu0 %1821 }
0x11df   :  { %3818 = vtanh.f32 %v1826_v63 }
0x11e9   :  { %v3819_v6 = vpop.eup %3818 }
0x11ea   :  { %v1828_v8 = vmul.f32 %v3819_v6, %v1822_v60  ;;  %v2174_v6 = vld [vmem:[%s4595_s7 + $0x60] sm:$0xff]  ;;  %v2175_v60 = vld [vmem:[%s4595_s7 + $0x68] sm:$0xff] }
0x11ec   :  { %3158 = vmatmul.mubr.f32.vlgmr.msra.gmra.mrb[20].mxu1 %v1828_v8  ;;  %v3700_v8 = vpack.c.bf16 %v2175_v60, %v2174_v6 }
0x11ed   :  { %3659 = vmatpush3.bf16.msra.mxu1 %v4291_v37  ;;  %3227 = vmatprep.mubr.msk.f32.mxu1 %vm3920_vm0, %v3921_v1  ;;  %v1260_v37 = vadd.f32 %v4306_v47, %v4381_v14  ;;  %v2165_v14 = vld [vmem:[%s4595_s7 + $0x18] sm:$0xff] }
0x11ee   :  { %3660 = vmatprep.subr.bf16.mxu1 %v3919_v0  ;;  %v3685_v61 = vpack.c.bf16 %v2165_v14, %v2164_v55 }
0x11f1   :  { %3662 = vmatpush3.bf16.msra.mxu1 %v4300_v43 }
0x11f2   :  { %3663 = vmatprep.subr.bf16.mxu1 %v3919_v0 }
0x11f5   :  { %3665 = vmatpush3.bf16.msra.mxu1 %v4308_v48 }
0x11f6   :  { %3666 = vmatprep.subr.bf16.mxu1 %v3919_v0 }
0x11f9   :  { %3668 = vmatpush3.bf16.msra.mxu1 %v4314_v52 }
0x11fa   :  { %3669 = vmatprep.subr.bf16.mxu1 %v3919_v0 }
0x11fd   :  { %3671 = vmatpush3.bf16.msra.mxu1 %v4318_v56 }
0x11fe   :  { %3672 = vmatprep.subr.bf16.mxu1 %v3919_v0 }
0x1201   :  { %3674 = vmatpush3.bf16.msra.mxu1 %v4322_v62 }
0x1202   :  { %3675 = vmatprep.subr.bf16.mxu1 %v3919_v0 }
0x1205   :  { %3677 = vmatpush3.bf16.msra.mxu1 %v4326_v13 }
0x1206   :  { %3678 = vmatprep.subr.bf16.mxu1 %v3919_v0 }
0x1209   :  { %3680 = vmatpush3.bf16.msra.mxu1 %v4330_v19 }
0x12bf   :  { %v1915_v43 = vpop.f32.mrb[20].mxu1 }
0x12c0   :  { %v1919_v48 = vadd.f32 %v1915_v43, %v1260_v37  ;;  %v3159_v52 = vpop.f32.mrb[21].mxu1  ;;  %v2176_v37 = vld [vmem:[%s4595_s7 + $0x70] sm:$0xff]  ;;  %v2177_v43 = vld [vmem:[%s4595_s7 + $0x78] sm:$0xff] }
0x12c1   :  { %v3703_v52 = vpack.c.bf16 %v2177_v43, %v2176_v37 }
0x12c2   :  { %v2286_v9 = vmul.f32 -1.442695, %v1919_v48  ;;  %3820 = vtanh.f32 %v1919_v48 }
0x12c4   :  { %3822 = vpow2.f32 %v2286_v9 }
0x12cc   :  { %v3821_v56 = vpop.eup %3820 }
0x12cd   :  { %1929 = vrot.lane.b32.xlu0 %v3821_v56, %s3924_s24 }
0x12ce   :  { %v3823_v62 = vpop.eup %3822 }
0x12cf   :  { %v1923_v10 = vadd.f32 1.0, %v3823_v62 }
0x12d1   :  { %3824 = vrcp.f32 %v1923_v10 }
0x12db   :  { %v3825_v13 = vpop.eup %3824 }
0x12dc   :  { %1927 = vrot.lane.b32.xlu1 %v3825_v13, %s3923_s19 }
0x12e0   :  { %1931 = vrot.lane.b32.xlu1 %v3825_v13, %s3922_s18 }
0x133f   :  { %v1930_v19 = vpop.permute.xlu0 %1929 }
0x1340   :  { %v1935_v47 = vmul.f32 %v3825_v13, %v1930_v19 }
0x134e   :  { %v1928_v11 = vpop.permute.xlu1 %1927 }
0x134f   :  { %v1934_v12 = vmul.f32 %v1928_v11, %v1826_v63  ;;  %v3697_v63 = vpack.c.bf16 %v2173_v35, %v2172_v49 }
0x1351   :  { %v1936_v31 = vadd.f32 %v1935_v47, %v1934_v12  ;;  %v2289_v47 = vld [vmem:[%s4596_s8] ss:$0 sm:$0xff] }
0x1352   :  { %v1932_v15 = vpop.permute.xlu1 %1931 }
0x1353   :  { %3826 = vtanh.f32 %v1936_v31 }
0x135d   :  { %v3827_v59 = vpop.eup %3826 }
0x135e   :  { %v1938_v17 = vmul.f32 %v3827_v59, %v1932_v15 }
0x1360   :  { %3193 = vmatmul.mubr.f32.vlgmr.msra.gmra.mrb[22].mxu0 %v1938_v17 }
0x1361   :  { %3262 = vmatprep.mubr.msk.f32.mxu0 %vm3920_vm0, %v3921_v1  ;;  %3683 = vmatpush3.bf16.msra.mxu0 %v3682_v42 }
0x1362   :  { %3684 = vmatprep.subr.bf16.mxu0 %v3919_v0 }
0x1365   :  { %3686 = vmatpush3.bf16.msra.mxu0 %v3685_v61 }
0x1366   :  { %3687 = vmatprep.subr.bf16.mxu0 %v3919_v0 }
0x1369   :  { %3689 = vmatpush3.bf16.msra.mxu0 %v3688_v2 }
0x136a   :  { %3690 = vmatprep.subr.bf16.mxu0 %v3919_v0 }
0x136d   :  { %3692 = vmatpush3.bf16.msra.mxu0 %v3691_v25 }
0x136e   :  { %3693 = vmatprep.subr.bf16.mxu0 %v3919_v0 }
0x1371   :  { %3695 = vmatpush3.bf16.msra.mxu0 %v3694_v41 }
0x1372   :  { %3696 = vmatprep.subr.bf16.mxu0 %v3919_v0 }
0x1375   :  { %3698 = vmatpush3.bf16.msra.mxu0 %v3697_v63 }
0x1376   :  { %3699 = vmatprep.subr.bf16.mxu0 %v3919_v0 }
0x1379   :  { %3701 = vmatpush3.bf16.msra.mxu0 %v3700_v8 }
0x137a   :  { %3702 = vmatprep.subr.bf16.mxu0 %v3919_v0 }
0x137d   :  { %3704 = vmatpush3.bf16.msra.mxu0 %v3703_v52 }
0x1433   :  { %v2025_v21 = vpop.f32.mrb[22].mxu0 }
0x1434   :  { %v2029_v44 = vadd.f32 %v2025_v21, %v1265_v18  ;;  %v3194_v23 = vpop.f32.mrb[23].mxu0 }
0x1436   :  { %v2287_v24 = vmul.f32 -1.442695, %v2029_v44  ;;  %3828 = vtanh.f32 %v2029_v44 }
0x1438   :  { %3830 = vpow2.f32 %v2287_v24 }
0x1440   :  { %v3829_v26 = vpop.eup %3828 }
0x1441   :  { %2039 = vrot.lane.b32.xlu1 %v3829_v26, %s3924_s24 }
0x1442   :  { %v3831_v27 = vpop.eup %3830 }
0x1443   :  { %v2033_v29 = vadd.f32 1.0, %v3831_v27 }
0x1445   :  { %3832 = vrcp.f32 %v2033_v29 }
0x144f   :  { %v3833_v30 = vpop.eup %3832 }
0x1450   :  { %2037 = vrot.lane.b32.xlu0 %v3833_v30, %s3923_s19 }
0x1454   :  { %2041 = vrot.lane.b32.xlu0 %v3833_v30, %s3922_s18 }
0x14b3   :  { %v2040_v1 = vpop.permute.xlu1 %2039 }
0x14b4   :  { %v2045_v54 = vmul.f32 %v3833_v30, %v2040_v1 }
0x14c2   :  { %v2038_v57 = vpop.permute.xlu0 %2037 }
0x14c3   :  { %v2044_v32 = vmul.f32 %v2038_v57, %v1936_v31 }
0x14c5   :  { %v4518_v33 = vadd.f32 %v2045_v54, %v2044_v32 }
0x14c6   :  { %v2042_v38 = vpop.permute.xlu0 %2041 }
0x14c7   :  { %3834 = vtanh.f32 %v4518_v33 }
0x14d1   :  { %v3835_v34 = vpop.eup %3834 }
0x14d2   :  { %v2048_v39 = vmul.f32 %v3835_v34, %v2042_v38 }
0x14d4   :  { %3228 = vmatmul.mubr.f32.vlgmr.msra.gmra.mrb[22].mxu1 %v2048_v39 }
0x15a7   :  { %v2135_v50 = vpop.f32.mrb[22].mxu1 }
0x15a8   :  { %v2139_v51 = vadd.f32 %v2135_v50, %v1270_v40  ;;  %v3229_v53 = vpop.f32.mrb[23].mxu1 }
0x15aa   :  { %v2288_v5 = vmul.f32 -1.442695, %v2139_v51  ;;  %3836 = vtanh.f32 %v2139_v51 }
0x15ac   :  { %3838 = vpow2.f32 %v2288_v5 }
0x15b4   :  { %v3837_v28 = vpop.eup %3836 }
0x15b5   :  { %2149 = vrot.lane.b32.xlu0 %v3837_v28, %s3924_s24 }
0x15b6   :  { %v3839_v4 = vpop.eup %3838 }
0x15b7   :  { %v2143_v36 = vadd.f32 1.0, %v3839_v4 }
0x15b9   :  { %3840 = vrcp.f32 %v2143_v36 }
0x15c3   :  { %v3841_v48 = vpop.eup %3840 }
0x15c4   :  { %2147 = vrot.lane.b32.xlu1 %v3841_v48, %s3923_s19 }
0x15c8   :  { %2151 = vrot.lane.b32.xlu1 %v3841_v48, %s3922_s18 }
0x1627   :  { %v2150_v9 = vpop.permute.xlu0 %2149 }
0x1628   :  { %v2155_v62 = vmul.f32 %v3841_v48, %v2150_v9 }
0x1636   :  { %v2148_v56 = vpop.permute.xlu1 %2147 }
0x1637   :  { %v2154_v0 = vmul.f32 %v2148_v56, %v4518_v33 }
0x1639   :  { %v2156_v10 = vadd.f32 %v2155_v62, %v2154_v0 }
0x163a   :  { %v2152_v19 = vpop.permute.xlu1 %2151 }
0x163b   :  { %3842 = vtanh.f32 %v2156_v10 }
0x1645   :  { %v3843_v13 = vpop.eup %3842 }
0x1646   :  { %v2158_v11 = vmul.f32 %v3843_v13, %v2152_v19 }
0x1648   :  { %3263 = vmatmul.mubr.f32.vlgmr.msra.gmra.mrb[24].mxu0 %v2158_v11 }
0x171b   :  { %v2251_v12 = vpop.f32.mrb[24].mxu0 }
0x171c   :  { %v2252_v31 = vadd.f32 %v2289_v47, %v2251_v12  ;;  %v3264_v59 = vpop.f32.mrb[25].mxu0 }
0x171e   :  { %2255 = vst [vmem:[%s4597_s9] sm:$0xff] %v2252_v31 }
0x171f   :  { %2260 = vsyncpa [#allocation7], 1 }
0x1720   :  { %2261 = vsyncpa [#allocation9], 1 }

</bundles_post_ra>
